<compile_context>
chip_gen: v5e
topology: v5e:2x2
jax: 0.10.0
libtpu: 0.0.40
codegen_flags: <defaults>
</compile_context>

<pallas_src>
import functools

import jax
import jax.numpy as jnp
import numpy as np
from jax.experimental import pallas as pl
from jax.experimental.pallas import tpu as pltpu


# ---------------------------------------------------------------------------
# Constant helpers (baked into the program as compile-time constants)
# ---------------------------------------------------------------------------
def _upsample_matrix(H, W):
    """0/1 selection matrix U (H*W, 2H*2W): (x2d @ U)[c, q] = x[c, qi//2, qj//2]."""
    Ho, Wo = 2 * H, 2 * W
    U = np.zeros((H * W, Ho * Wo), np.float32)
    for i in range(Ho):
        for j in range(Wo):
            U[(i // 2) * W + (j // 2), i * Wo + j] = 1.0
    return U


def _tap_masks(Ho, Wo, ks, pd, dl):
    """(ks*ks, Ho*Wo) mask: 1.0 where the shifted source pixel is in-bounds."""
    masks = np.zeros((ks * ks, Ho * Wo), np.float32)
    ho = np.arange(Ho)[:, None]
    wo = np.arange(Wo)[None, :]
    for kh in range(ks):
        dh = kh * dl - pd
        for kw in range(ks):
            dw = kw * dl - pd
            ok = ((ho + dh >= 0) & (ho + dh < Ho) &
                  (wo + dw >= 0) & (wo + dw < Wo))
            masks[kh * ks + kw] = ok.astype(np.float32).reshape(-1)
    return masks


def _pick_batch_block(N, Cx, Cs, Cout, H, W, Hs, Ws, ks,
                      vmem_budget=6 << 20):
    """Largest divisor of N whose per-step working set fits the VMEM budget."""
    Cin = Cx + Cs
    HoWo = 4 * H * W
    per_sample = 4 * (Cx * H * W + Cs * Hs * Ws + Cin * HoWo
                      + ks * ks * Cin * HoWo + ks * ks * Cout * HoWo
                      + 2 * Cout * HoWo)          # f32, rough upper bound
    nb = max(1, min(N, vmem_budget // max(per_sample, 1)))
    while N % nb:
        nb -= 1
    return nb


# ---------------------------------------------------------------------------
# In-kernel building blocks
# ---------------------------------------------------------------------------
def _im2col(img, masks, *, Wo, ks, pd, dl):
    """img: (C, L) lane-concatenated batch block.  Returns (ks*ks*C, L).

    Zero padding (and isolation between lane-concatenated samples) is
    realised via per-tap border masks; the per-tap spatial shift is a static
    lane shift (slice + zero fill), so no jnp.pad and no lane/sublane-mixing
    reshapes are needed.  The fully in-bounds centre tap skips its mask.
    """
    C, L = img.shape
    taps = []
    for kh in range(ks):
        dh = kh * dl - pd
        for kw in range(ks):
            dw = kw * dl - pd
            s = dh * Wo + dw
            if s > 0:
                shifted = jnp.concatenate(
                    [img[:, s:], jnp.zeros((C, s), img.dtype)], axis=1)
            elif s < 0:
                shifted = jnp.concatenate(
                    [jnp.zeros((C, -s), img.dtype), img[:, :L + s]], axis=1)
            else:
                shifted = img
            t = kh * ks + kw
            if dh == 0 and dw == 0:
                taps.append(shifted)                 # no border, no leak: skip mask
            else:
                taps.append(shifted * masks[t:t + 1, :])
    return jnp.concatenate(taps, axis=0)             # (ks*ks*C, L)


def _conv_bn_relu(img, wt, bias, masks, *, Wo, ks, pd, dl):
    """3x3 'same' conv (BN scale pre-folded into wt) + bias + ReLU.

    One K-merged MXU contraction: (Cout, K) @ (K, L) -> lane-dense result.
    """
    patches = _im2col(img, masks, Wo=Wo, ks=ks, pd=pd, dl=dl)
    acc = jnp.dot(wt, patches, preferred_element_type=jnp.float32)
    return jnp.maximum(acc + bias, 0.0)


def _decoder_block_kernel(x_ref, skip_ref, up_ref, mask_ref,
                          w1_ref, b1_ref, w2_ref, b2_ref, o_ref,
                          *, NB, Ho, Wo, Ws, delta, ks, pd, dl):
    """One batch block of NB samples per grid step.

    x_ref    : (NB, Cx, H*W)       flattened NCHW input block
    skip_ref : (NB, Cs, Hs*Ws)     flattened NCHW skip block
    up_ref   : (H*W, Ho*Wo)        constant 0/1 2x-nearest upsample matrix
    mask_ref : (ks*ks, NB*Ho*Wo)   constant border masks, tiled per sample
    w1_ref   : (Cout, ks*ks*Cin)   conv1 weights, BN1 scale folded in
    b1_ref   : (Cout, 1)           folded BN1 bias
    w2_ref   : (Cout, ks*ks*Cout)  conv2 weights, BN2 scale folded in
    b2_ref   : (Cout, 1)           folded BN2 bias
    o_ref    : (NB, Cout, Ho*Wo)   lane-dense output slab
    """
    HoWo = Ho * Wo
    upmat = up_ref[...]
    masks = mask_ref[...]

    # Per-sample: 2x nearest upsample (exact selection matmul), centre crop of
    # the skip (static lane slices), channel concat.  Samples are then
    # lane-concatenated so both convs run as a single batched contraction.
    imgs = []
    for i in range(NB):
        up = jnp.dot(x_ref[i], upmat,
                     preferred_element_type=jnp.float32)        # (Cx, Ho*Wo)
        skip2d = skip_ref[i]                                     # (Cs, Hs*Ws)
        rows = []
        for ho in range(Ho):
            start = (ho + delta) * Ws + delta
            rows.append(skip2d[:, start:start + Wo])
        cropped = jnp.concatenate(rows, axis=1)                  # (Cs, Ho*Wo)
        imgs.append(jnp.concatenate([cropped, up], axis=0))      # (Cin, Ho*Wo)
    img_b = imgs[0] if NB == 1 else jnp.concatenate(imgs, axis=1)

    h = _conv_bn_relu(img_b, w1_ref[...], b1_ref[...], masks,
                      Wo=Wo, ks=ks, pd=pd, dl=dl)
    h = _conv_bn_relu(h, w2_ref[...], b2_ref[...], masks,
                      Wo=Wo, ks=ks, pd=pd, dl=dl)                # (Cout, NB*Ho*Wo)

    # 256-lane-aligned per-sample stores.
    for i in range(NB):
        o_ref[i] = h[:, i * HoWo:(i + 1) * HoWo]


# ---------------------------------------------------------------------------
# DecoderBlock forward (NCHW in / NCHW out, matching the PyTorch module)
# ---------------------------------------------------------------------------
def decoder_block_forward(x, skip, params, *, ks=3, pd=1, dl=1, eps=1e-5,
                          batch_block=None):
    N, Cx, H, W = x.shape
    _, Cs, Hs, Ws = skip.shape
    Ho, Wo = 2 * H, 2 * W
    if 2 * pd != dl * (ks - 1):
        raise ValueError("fused kernel assumes a 'same'-size convolution")
    delta = (Hs - Ho) // 2                          # crop_tensor semantics
    assert Hs - 2 * delta == Ho and Ws - 2 * delta == Wo
    Cout = params["w1"].shape[-1]
    Cin = Cs + Cx

    NB = batch_block or _pick_batch_block(N, Cx, Cs, Cout, H, W, Hs, Ws, ks)
    assert N % NB == 0
    G = N // NB

    # Fold BN (inference) into the conv: scale into weights, rest into bias.
    def fold(w_hwio, conv_b, bn):
        gamma, beta, mean, var = bn
        scale = gamma / jnp.sqrt(var + eps)
        wt = (jnp.transpose(w_hwio, (3, 0, 1, 2)).reshape(Cout, -1)
              * scale[:, None]).astype(jnp.float32)          # (Cout, ks*ks*Cin)
        bias = (beta + (conv_b - mean) * scale).reshape(Cout, 1).astype(jnp.float32)
        return wt, bias

    w1t, b1 = fold(params["w1"], params["b1"], params["bn1"])
    w2t, b2 = fold(params["w2"], params["b2"], params["bn2"])

    upmat = jnp.asarray(_upsample_matrix(H, W))                        # (H*W, Ho*Wo)
    masks = jnp.asarray(np.tile(_tap_masks(Ho, Wo, ks, pd, dl), (1, NB)))

    x2d = x.reshape(N, Cx, H * W).astype(jnp.float32)
    skip2d = skip.reshape(N, Cs, Hs * Ws).astype(jnp.float32)

    kernel = functools.partial(
        _decoder_block_kernel,
        NB=NB, Ho=Ho, Wo=Wo, Ws=Ws, delta=delta, ks=ks, pd=pd, dl=dl)

    out2d = pl.pallas_call(
        kernel,
        out_shape=jax.ShapeDtypeStruct((N, Cout, Ho * Wo), jnp.float32),
        grid_spec=pltpu.PrefetchScalarGridSpec(
            num_scalar_prefetch=0,
            grid=(G,),
            in_specs=[
                pl.BlockSpec((NB, Cx, H * W), lambda b: (b, 0, 0)),
                pl.BlockSpec((NB, Cs, Hs * Ws), lambda b: (b, 0, 0)),
                pl.BlockSpec((H * W, Ho * Wo), lambda b: (0, 0)),
                pl.BlockSpec((ks * ks, NB * Ho * Wo), lambda b: (0, 0)),
                pl.BlockSpec((Cout, ks * ks * Cin), lambda b: (0, 0)),
                pl.BlockSpec((Cout, 1), lambda b: (0, 0)),
                pl.BlockSpec((Cout, ks * ks * Cout), lambda b: (0, 0)),
                pl.BlockSpec((Cout, 1), lambda b: (0, 0)),
            ],
            out_specs=pl.BlockSpec((NB, Cout, Ho * Wo), lambda b: (b, 0, 0)),
        ),
        compiler_params=pltpu.CompilerParams(
            dimension_semantics=("parallel",)),
    )(x2d, skip2d, upmat, masks, w1t, b1, w2t, b2)

    return out2d.reshape(N, Cout, Ho, Wo)                     # NCHW out


# ---------------------------------------------------------------------------
# Pure-JAX reference (mirrors the PyTorch forward with the fixed choices)
# ---------------------------------------------------------------------------
def decoder_block_reference(x, skip, params, *, ks=3, pd=1, dl=1, eps=1e-5):
    up = jnp.repeat(jnp.repeat(x, 2, axis=2), 2, axis=3)       # NCHW, 2x nearest
    tgt, src = up.shape[2], skip.shape[2]
    d = (src - tgt) // 2
    cropped = skip[:, :, d:src - d, d:src - d]
    cat = jnp.concatenate([cropped, up], axis=1)
    h = jnp.transpose(cat, (0, 2, 3, 1))                       # NHWC

    def conv_bn_relu(h, w, b, bn):
        gamma, beta, mean, var = bn
        y = jax.lax.conv_general_dilated(
            h, w, (1, 1), [(pd, pd), (pd, pd)], rhs_dilation=(dl, dl),
            dimension_numbers=("NHWC", "HWIO", "NHWC"),
            precision=jax.lax.Precision.HIGHEST) + b
        y = (y - mean) * (gamma / jnp.sqrt(var + eps)) + beta
        return jnp.maximum(y, 0.0)

    h = conv_bn_relu(h, params["w1"], params["b1"], params["bn1"])
    h = conv_bn_relu(h, params["w2"], params["b2"], params["bn2"])
    return jnp.transpose(h, (0, 3, 1, 2))                      # NCHW


# ---------------------------------------------------------------------------
# Deterministic parameter initialization (shapes implied by module __init__)
# ---------------------------------------------------------------------------
def init_params(key, cin, cout, ks):
    keys = jax.random.split(key, 6)

    def bn_params(k):
        kg, kb, km, kv = jax.random.split(k, 4)
        gamma = 1.0 + 0.1 * jax.random.normal(kg, (cout,), jnp.float32)
        beta = 0.1 * jax.random.normal(kb, (cout,), jnp.float32)
        mean = 0.1 * jax.random.normal(km, (cout,), jnp.float32)
        var = jax.random.uniform(kv, (cout,), jnp.float32, 0.5, 1.5)
        return gamma, beta, mean, var

    return dict(
        w1=0.1 * jax.random.normal(keys[0], (ks, ks, cin, cout), jnp.float32),
        b1=0.05 * jax.random.normal(keys[1], (cout,), jnp.float32),
        bn1=bn_params(keys[2]),
        w2=0.1 * jax.random.normal(keys[3], (ks, ks, cout, cout), jnp.float32),
        b2=0.05 * jax.random.normal(keys[4], (cout,), jnp.float32),
        bn2=bn_params(keys[5]),
    )


if __name__ == "__main__":
    # Shapes consistent with the forward:
    #   x    : (N, Cx, 8, 8)   -> upsampled to (N, Cx, 16, 16)
    #   skip : (N, Cs, 20, 20) -> cropped to   (N, Cs, 16, 16)
    #   concat channels Cin = Cx + Cs = 8, out_channels = 4, ks=3, pd=1, dl=1
    N, Cx, Hx = 2, 4, 8
    Cs, Hs = 4, 20
    Cout, ks, pd, dl = 4, 3, 1, 1
    Cin = Cx + Cs

    key = jax.random.PRNGKey(0)
    kx, kskip, kparams = jax.random.split(key, 3)
    x = jax.random.normal(kx, (N, Cx, Hx, Hx), jnp.float32)
    skip = jax.random.normal(kskip, (N, Cs, Hs, Hs), jnp.float32)
    params = init_params(kparams, Cin, Cout, ks)

    fwd = jax.jit(functools.partial(decoder_block_forward, ks=ks, pd=pd, dl=dl))
    out = jax.block_until_ready(fwd(x, skip, params))

    ref = decoder_block_reference(x, skip, params, ks=ks, pd=pd, dl=dl)
    np.testing.assert_allclose(np.asarray(out), np.asarray(ref),
                               rtol=5e-3, atol=5e-3)
    assert out.shape == (N, Cout, 2 * Hx, 2 * Hx)
    print("KERNEL_OK")
</pallas_src>

<mosaic_0001>
module attributes {stable_mosaic.version = 11 : i64} {
  func.func @_decoder_block_kernel(%arg0: i32, %arg1: memref<2x4x64xf32, #tpu.memory_space<vmem>>, %arg2: memref<2x4x400xf32, #tpu.memory_space<vmem>>, %arg3: memref<64x256xf32, #tpu.memory_space<vmem>>, %arg4: memref<9x512xf32, #tpu.memory_space<vmem>>, %arg5: memref<4x72xf32, #tpu.memory_space<vmem>>, %arg6: memref<4x1xf32, #tpu.memory_space<vmem>>, %arg7: memref<4x36xf32, #tpu.memory_space<vmem>>, %arg8: memref<4x1xf32, #tpu.memory_space<vmem>>, %arg9: memref<2x4x256xf32, #tpu.memory_space<vmem>>) attributes {dimension_semantics = [#tpu.dimension_semantics<parallel>], iteration_bounds = array<i64: 1>, scalar_prefetch = 0 : i64, scratch_operands = 0 : i64, tpu.core_type = #tpu.core_type<tc>, window_params = [{transform_indices = @transform_0, window_bounds = array<i64: 2, 4, 64>}, {transform_indices = @transform_1, window_bounds = array<i64: 2, 4, 400>}, {pipeline_mode = #tpu.pipeline_mode<synchronous>, transform_indices = @transform_2, window_bounds = array<i64: 64, 256>}, {pipeline_mode = #tpu.pipeline_mode<synchronous>, transform_indices = @transform_3, window_bounds = array<i64: 9, 512>}, {pipeline_mode = #tpu.pipeline_mode<synchronous>, transform_indices = @transform_4, window_bounds = array<i64: 4, 72>}, {pipeline_mode = #tpu.pipeline_mode<synchronous>, transform_indices = @transform_5, window_bounds = array<i64: 4, 1>}, {pipeline_mode = #tpu.pipeline_mode<synchronous>, transform_indices = @transform_6, window_bounds = array<i64: 4, 36>}, {pipeline_mode = #tpu.pipeline_mode<synchronous>, transform_indices = @transform_7, window_bounds = array<i64: 4, 1>}, {transform_indices = @transform_8, window_bounds = array<i64: 2, 4, 256>}]} {
    %c0 = arith.constant 0 : index
    %c0_0 = arith.constant 0 : index
    %0 = vector.load %arg3[%c0, %c0_0] : memref<64x256xf32, #tpu.memory_space<vmem>>, vector<64x256xf32>
    %c0_1 = arith.constant 0 : index
    %c0_2 = arith.constant 0 : index
    %1 = vector.load %arg4[%c0_1, %c0_2] : memref<9x512xf32, #tpu.memory_space<vmem>>, vector<9x512xf32>
    %c0_3 = arith.constant 0 : index
    %c0_4 = arith.constant 0 : index
    %c0_5 = arith.constant 0 : index
    %2 = vector.load %arg1[%c0_3, %c0_4, %c0_5] : memref<2x4x64xf32, #tpu.memory_space<vmem>>, vector<1x4x64xf32>
    %3 = vector.shape_cast %2 : vector<1x4x64xf32> to vector<4x64xf32>
    %cst = arith.constant dense<0.000000e+00> : vector<4x256xf32>
    %4 = tpu.matmul %3, %0, %cst {dimension_numbers = #tpu.dot_dimension_numbers<[1], [0], [0], [1], [0, 0, 1, 1], [], []>} : vector<4x64xf32>, vector<64x256xf32>, vector<4x256xf32> -> vector<4x256xf32>
    %c0_6 = arith.constant 0 : index
    %c0_7 = arith.constant 0 : index
    %c0_8 = arith.constant 0 : index
    %5 = vector.load %arg2[%c0_6, %c0_7, %c0_8] : memref<2x4x400xf32, #tpu.memory_space<vmem>>, vector<1x4x400xf32>
    %6 = vector.shape_cast %5 : vector<1x4x400xf32> to vector<4x400xf32>
    %7 = vector.extract_strided_slice %6 {offsets = [0, 42], sizes = [4, 16], strides = [1, 1]} : vector<4x400xf32> to vector<4x16xf32>
    %8 = vector.extract_strided_slice %6 {offsets = [0, 62], sizes = [4, 16], strides = [1, 1]} : vector<4x400xf32> to vector<4x16xf32>
    %9 = vector.extract_strided_slice %6 {offsets = [0, 82], sizes = [4, 16], strides = [1, 1]} : vector<4x400xf32> to vector<4x16xf32>
    %10 = vector.extract_strided_slice %6 {offsets = [0, 102], sizes = [4, 16], strides = [1, 1]} : vector<4x400xf32> to vector<4x16xf32>
    %11 = vector.extract_strided_slice %6 {offsets = [0, 122], sizes = [4, 16], strides = [1, 1]} : vector<4x400xf32> to vector<4x16xf32>
    %12 = vector.extract_strided_slice %6 {offsets = [0, 142], sizes = [4, 16], strides = [1, 1]} : vector<4x400xf32> to vector<4x16xf32>
    %13 = vector.extract_strided_slice %6 {offsets = [0, 162], sizes = [4, 16], strides = [1, 1]} : vector<4x400xf32> to vector<4x16xf32>
    %14 = vector.extract_strided_slice %6 {offsets = [0, 182], sizes = [4, 16], strides = [1, 1]} : vector<4x400xf32> to vector<4x16xf32>
    %15 = vector.extract_strided_slice %6 {offsets = [0, 202], sizes = [4, 16], strides = [1, 1]} : vector<4x400xf32> to vector<4x16xf32>
    %16 = vector.extract_strided_slice %6 {offsets = [0, 222], sizes = [4, 16], strides = [1, 1]} : vector<4x400xf32> to vector<4x16xf32>
    %17 = vector.extract_strided_slice %6 {offsets = [0, 242], sizes = [4, 16], strides = [1, 1]} : vector<4x400xf32> to vector<4x16xf32>
    %18 = vector.extract_strided_slice %6 {offsets = [0, 262], sizes = [4, 16], strides = [1, 1]} : vector<4x400xf32> to vector<4x16xf32>
    %19 = vector.extract_strided_slice %6 {offsets = [0, 282], sizes = [4, 16], strides = [1, 1]} : vector<4x400xf32> to vector<4x16xf32>
    %20 = vector.extract_strided_slice %6 {offsets = [0, 302], sizes = [4, 16], strides = [1, 1]} : vector<4x400xf32> to vector<4x16xf32>
    %21 = vector.extract_strided_slice %6 {offsets = [0, 322], sizes = [4, 16], strides = [1, 1]} : vector<4x400xf32> to vector<4x16xf32>
    %22 = vector.extract_strided_slice %6 {offsets = [0, 342], sizes = [4, 16], strides = [1, 1]} : vector<4x400xf32> to vector<4x16xf32>
    %23 = tpu.concatenate %7, %8, %9, %10, %11, %12, %13, %14, %15, %16, %17, %18, %19, %20, %21, %22 in 1 : vector<4x16xf32>, vector<4x16xf32>, vector<4x16xf32>, vector<4x16xf32>, vector<4x16xf32>, vector<4x16xf32>, vector<4x16xf32>, vector<4x16xf32>, vector<4x16xf32>, vector<4x16xf32>, vector<4x16xf32>, vector<4x16xf32>, vector<4x16xf32>, vector<4x16xf32>, vector<4x16xf32>, vector<4x16xf32> -> vector<4x256xf32>
    %24 = tpu.concatenate %23, %4 in 0 : vector<4x256xf32>, vector<4x256xf32> -> vector<8x256xf32>
    %c1 = arith.constant 1 : index
    %c0_9 = arith.constant 0 : index
    %c0_10 = arith.constant 0 : index
    %25 = vector.load %arg1[%c1, %c0_9, %c0_10] : memref<2x4x64xf32, #tpu.memory_space<vmem>>, vector<1x4x64xf32>
    %26 = vector.shape_cast %25 : vector<1x4x64xf32> to vector<4x64xf32>
    %cst_11 = arith.constant dense<0.000000e+00> : vector<4x256xf32>
    %27 = tpu.matmul %26, %0, %cst_11 {dimension_numbers = #tpu.dot_dimension_numbers<[1], [0], [0], [1], [0, 0, 1, 1], [], []>} : vector<4x64xf32>, vector<64x256xf32>, vector<4x256xf32> -> vector<4x256xf32>
    %c1_12 = arith.constant 1 : index
    %c0_13 = arith.constant 0 : index
    %c0_14 = arith.constant 0 : index
    %28 = vector.load %arg2[%c1_12, %c0_13, %c0_14] : memref<2x4x400xf32, #tpu.memory_space<vmem>>, vector<1x4x400xf32>
    %29 = vector.shape_cast %28 : vector<1x4x400xf32> to vector<4x400xf32>
    %30 = vector.extract_strided_slice %29 {offsets = [0, 42], sizes = [4, 16], strides = [1, 1]} : vector<4x400xf32> to vector<4x16xf32>
    %31 = vector.extract_strided_slice %29 {offsets = [0, 62], sizes = [4, 16], strides = [1, 1]} : vector<4x400xf32> to vector<4x16xf32>
    %32 = vector.extract_strided_slice %29 {offsets = [0, 82], sizes = [4, 16], strides = [1, 1]} : vector<4x400xf32> to vector<4x16xf32>
    %33 = vector.extract_strided_slice %29 {offsets = [0, 102], sizes = [4, 16], strides = [1, 1]} : vector<4x400xf32> to vector<4x16xf32>
    %34 = vector.extract_strided_slice %29 {offsets = [0, 122], sizes = [4, 16], strides = [1, 1]} : vector<4x400xf32> to vector<4x16xf32>
    %35 = vector.extract_strided_slice %29 {offsets = [0, 142], sizes = [4, 16], strides = [1, 1]} : vector<4x400xf32> to vector<4x16xf32>
    %36 = vector.extract_strided_slice %29 {offsets = [0, 162], sizes = [4, 16], strides = [1, 1]} : vector<4x400xf32> to vector<4x16xf32>
    %37 = vector.extract_strided_slice %29 {offsets = [0, 182], sizes = [4, 16], strides = [1, 1]} : vector<4x400xf32> to vector<4x16xf32>
    %38 = vector.extract_strided_slice %29 {offsets = [0, 202], sizes = [4, 16], strides = [1, 1]} : vector<4x400xf32> to vector<4x16xf32>
    %39 = vector.extract_strided_slice %29 {offsets = [0, 222], sizes = [4, 16], strides = [1, 1]} : vector<4x400xf32> to vector<4x16xf32>
    %40 = vector.extract_strided_slice %29 {offsets = [0, 242], sizes = [4, 16], strides = [1, 1]} : vector<4x400xf32> to vector<4x16xf32>
    %41 = vector.extract_strided_slice %29 {offsets = [0, 262], sizes = [4, 16], strides = [1, 1]} : vector<4x400xf32> to vector<4x16xf32>
    %42 = vector.extract_strided_slice %29 {offsets = [0, 282], sizes = [4, 16], strides = [1, 1]} : vector<4x400xf32> to vector<4x16xf32>
    %43 = vector.extract_strided_slice %29 {offsets = [0, 302], sizes = [4, 16], strides = [1, 1]} : vector<4x400xf32> to vector<4x16xf32>
    %44 = vector.extract_strided_slice %29 {offsets = [0, 322], sizes = [4, 16], strides = [1, 1]} : vector<4x400xf32> to vector<4x16xf32>
    %45 = vector.extract_strided_slice %29 {offsets = [0, 342], sizes = [4, 16], strides = [1, 1]} : vector<4x400xf32> to vector<4x16xf32>
    %46 = tpu.concatenate %30, %31, %32, %33, %34, %35, %36, %37, %38, %39, %40, %41, %42, %43, %44, %45 in 1 : vector<4x16xf32>, vector<4x16xf32>, vector<4x16xf32>, vector<4x16xf32>, vector<4x16xf32>, vector<4x16xf32>, vector<4x16xf32>, vector<4x16xf32>, vector<4x16xf32>, vector<4x16xf32>, vector<4x16xf32>, vector<4x16xf32>, vector<4x16xf32>, vector<4x16xf32>, vector<4x16xf32>, vector<4x16xf32> -> vector<4x256xf32>
    %47 = tpu.concatenate %46, %27 in 0 : vector<4x256xf32>, vector<4x256xf32> -> vector<8x256xf32>
    %48 = tpu.concatenate %24, %47 in 1 : vector<8x256xf32>, vector<8x256xf32> -> vector<8x512xf32>
    %c0_15 = arith.constant 0 : index
    %c0_16 = arith.constant 0 : index
    %49 = vector.load %arg5[%c0_15, %c0_16] : memref<4x72xf32, #tpu.memory_space<vmem>>, vector<4x72xf32>
    %c0_17 = arith.constant 0 : index
    %c0_18 = arith.constant 0 : index
    %50 = vector.load %arg6[%c0_17, %c0_18] : memref<4x1xf32, #tpu.memory_space<vmem>>, vector<4x1xf32>
    %cst_19 = arith.constant 0.000000e+00 : f32
    %51 = vector.broadcast %cst_19 : f32 to vector<8x17xf32>
    %52 = vector.extract_strided_slice %48 {offsets = [0, 0], sizes = [8, 495], strides = [1, 1]} : vector<8x512xf32> to vector<8x495xf32>
    %53 = tpu.concatenate %51, %52 in 1 : vector<8x17xf32>, vector<8x495xf32> -> vector<8x512xf32>
    %54 = vector.extract_strided_slice %1 {offsets = [0, 0], sizes = [1, 512], strides = [1, 1]} : vector<9x512xf32> to vector<1x512xf32>
    %55 = vector.broadcast %54 : vector<1x512xf32> to vector<8x512xf32>
    %56 = arith.mulf %53, %55 : vector<8x512xf32>
    %cst_20 = arith.constant 0.000000e+00 : f32
    %57 = vector.broadcast %cst_20 : f32 to vector<8x16xf32>
    %58 = vector.extract_strided_slice %48 {offsets = [0, 0], sizes = [8, 496], strides = [1, 1]} : vector<8x512xf32> to vector<8x496xf32>
    %59 = tpu.concatenate %57, %58 in 1 : vector<8x16xf32>, vector<8x496xf32> -> vector<8x512xf32>
    %60 = vector.extract_strided_slice %1 {offsets = [1, 0], sizes = [1, 512], strides = [1, 1]} : vector<9x512xf32> to vector<1x512xf32>
    %61 = vector.broadcast %60 : vector<1x512xf32> to vector<8x512xf32>
    %62 = arith.mulf %59, %61 : vector<8x512xf32>
    %cst_21 = arith.constant 0.000000e+00 : f32
    %63 = vector.broadcast %cst_21 : f32 to vector<8x15xf32>
    %64 = vector.extract_strided_slice %48 {offsets = [0, 0], sizes = [8, 497], strides = [1, 1]} : vector<8x512xf32> to vector<8x497xf32>
    %65 = tpu.concatenate %63, %64 in 1 : vector<8x15xf32>, vector<8x497xf32> -> vector<8x512xf32>
    %66 = vector.extract_strided_slice %1 {offsets = [2, 0], sizes = [1, 512], strides = [1, 1]} : vector<9x512xf32> to vector<1x512xf32>
    %67 = vector.broadcast %66 : vector<1x512xf32> to vector<8x512xf32>
    %68 = arith.mulf %65, %67 : vector<8x512xf32>
    %cst_22 = arith.constant 0.000000e+00 : f32
    %69 = vector.broadcast %cst_22 : f32 to vector<8x1xf32>
    %70 = vector.extract_strided_slice %48 {offsets = [0, 0], sizes = [8, 511], strides = [1, 1]} : vector<8x512xf32> to vector<8x511xf32>
    %71 = tpu.concatenate %69, %70 in 1 : vector<8x1xf32>, vector<8x511xf32> -> vector<8x512xf32>
    %72 = vector.extract_strided_slice %1 {offsets = [3, 0], sizes = [1, 512], strides = [1, 1]} : vector<9x512xf32> to vector<1x512xf32>
    %73 = vector.broadcast %72 : vector<1x512xf32> to vector<8x512xf32>
    %74 = arith.mulf %71, %73 : vector<8x512xf32>
    %75 = vector.extract_strided_slice %48 {offsets = [0, 1], sizes = [8, 511], strides = [1, 1]} : vector<8x512xf32> to vector<8x511xf32>
    %cst_23 = arith.constant 0.000000e+00 : f32
    %76 = vector.broadcast %cst_23 : f32 to vector<8x1xf32>
    %77 = tpu.concatenate %75, %76 in 1 : vector<8x511xf32>, vector<8x1xf32> -> vector<8x512xf32>
    %78 = vector.extract_strided_slice %1 {offsets = [5, 0], sizes = [1, 512], strides = [1, 1]} : vector<9x512xf32> to vector<1x512xf32>
    %79 = vector.broadcast %78 : vector<1x512xf32> to vector<8x512xf32>
    %80 = arith.mulf %77, %79 : vector<8x512xf32>
    %81 = vector.extract_strided_slice %48 {offsets = [0, 15], sizes = [8, 497], strides = [1, 1]} : vector<8x512xf32> to vector<8x497xf32>
    %cst_24 = arith.constant 0.000000e+00 : f32
    %82 = vector.broadcast %cst_24 : f32 to vector<8x15xf32>
    %83 = tpu.concatenate %81, %82 in 1 : vector<8x497xf32>, vector<8x15xf32> -> vector<8x512xf32>
    %84 = vector.extract_strided_slice %1 {offsets = [6, 0], sizes = [1, 512], strides = [1, 1]} : vector<9x512xf32> to vector<1x512xf32>
    %85 = vector.broadcast %84 : vector<1x512xf32> to vector<8x512xf32>
    %86 = arith.mulf %83, %85 : vector<8x512xf32>
    %87 = vector.extract_strided_slice %48 {offsets = [0, 16], sizes = [8, 496], strides = [1, 1]} : vector<8x512xf32> to vector<8x496xf32>
    %cst_25 = arith.constant 0.000000e+00 : f32
    %88 = vector.broadcast %cst_25 : f32 to vector<8x16xf32>
    %89 = tpu.concatenate %87, %88 in 1 : vector<8x496xf32>, vector<8x16xf32> -> vector<8x512xf32>
    %90 = vector.extract_strided_slice %1 {offsets = [7, 0], sizes = [1, 512], strides = [1, 1]} : vector<9x512xf32> to vector<1x512xf32>
    %91 = vector.broadcast %90 : vector<1x512xf32> to vector<8x512xf32>
    %92 = arith.mulf %89, %91 : vector<8x512xf32>
    %93 = vector.extract_strided_slice %48 {offsets = [0, 17], sizes = [8, 495], strides = [1, 1]} : vector<8x512xf32> to vector<8x495xf32>
    %cst_26 = arith.constant 0.000000e+00 : f32
    %94 = vector.broadcast %cst_26 : f32 to vector<8x17xf32>
    %95 = tpu.concatenate %93, %94 in 1 : vector<8x495xf32>, vector<8x17xf32> -> vector<8x512xf32>
    %96 = vector.extract_strided_slice %1 {offsets = [8, 0], sizes = [1, 512], strides = [1, 1]} : vector<9x512xf32> to vector<1x512xf32>
    %97 = vector.broadcast %96 : vector<1x512xf32> to vector<8x512xf32>
    %98 = arith.mulf %95, %97 : vector<8x512xf32>
    %99 = tpu.concatenate %56, %62, %68, %74, %48, %80, %86, %92, %98 in 0 : vector<8x512xf32>, vector<8x512xf32>, vector<8x512xf32>, vector<8x512xf32>, vector<8x512xf32>, vector<8x512xf32>, vector<8x512xf32>, vector<8x512xf32>, vector<8x512xf32> -> vector<72x512xf32>
    %cst_27 = arith.constant dense<0.000000e+00> : vector<4x512xf32>
    %100 = tpu.matmul %49, %99, %cst_27 {dimension_numbers = #tpu.dot_dimension_numbers<[1], [0], [0], [1], [0, 0, 1, 1], [], []>} : vector<4x72xf32>, vector<72x512xf32>, vector<4x512xf32> -> vector<4x512xf32>
    %101 = vector.broadcast %50 : vector<4x1xf32> to vector<4x512xf32>
    %102 = arith.addf %100, %101 : vector<4x512xf32>
    %cst_28 = arith.constant 0.000000e+00 : f32
    %103 = vector.broadcast %cst_28 : f32 to vector<4x512xf32>
    %104 = arith.maximumf %102, %103 : vector<4x512xf32>
    %c0_29 = arith.constant 0 : index
    %c0_30 = arith.constant 0 : index
    %105 = vector.load %arg7[%c0_29, %c0_30] : memref<4x36xf32, #tpu.memory_space<vmem>>, vector<4x36xf32>
    %c0_31 = arith.constant 0 : index
    %c0_32 = arith.constant 0 : index
    %106 = vector.load %arg8[%c0_31, %c0_32] : memref<4x1xf32, #tpu.memory_space<vmem>>, vector<4x1xf32>
    %cst_33 = arith.constant 0.000000e+00 : f32
    %107 = vector.broadcast %cst_33 : f32 to vector<4x17xf32>
    %108 = vector.extract_strided_slice %104 {offsets = [0, 0], sizes = [4, 495], strides = [1, 1]} : vector<4x512xf32> to vector<4x495xf32>
    %109 = tpu.concatenate %107, %108 in 1 : vector<4x17xf32>, vector<4x495xf32> -> vector<4x512xf32>
    %110 = vector.extract_strided_slice %1 {offsets = [0, 0], sizes = [1, 512], strides = [1, 1]} : vector<9x512xf32> to vector<1x512xf32>
    %111 = vector.broadcast %110 : vector<1x512xf32> to vector<4x512xf32>
    %112 = arith.mulf %109, %111 : vector<4x512xf32>
    %cst_34 = arith.constant 0.000000e+00 : f32
    %113 = vector.broadcast %cst_34 : f32 to vector<4x16xf32>
    %114 = vector.extract_strided_slice %104 {offsets = [0, 0], sizes = [4, 496], strides = [1, 1]} : vector<4x512xf32> to vector<4x496xf32>
    %115 = tpu.concatenate %113, %114 in 1 : vector<4x16xf32>, vector<4x496xf32> -> vector<4x512xf32>
    %116 = vector.extract_strided_slice %1 {offsets = [1, 0], sizes = [1, 512], strides = [1, 1]} : vector<9x512xf32> to vector<1x512xf32>
    %117 = vector.broadcast %116 : vector<1x512xf32> to vector<4x512xf32>
    %118 = arith.mulf %115, %117 : vector<4x512xf32>
    %cst_35 = arith.constant 0.000000e+00 : f32
    %119 = vector.broadcast %cst_35 : f32 to vector<4x15xf32>
    %120 = vector.extract_strided_slice %104 {offsets = [0, 0], sizes = [4, 497], strides = [1, 1]} : vector<4x512xf32> to vector<4x497xf32>
    %121 = tpu.concatenate %119, %120 in 1 : vector<4x15xf32>, vector<4x497xf32> -> vector<4x512xf32>
    %122 = vector.extract_strided_slice %1 {offsets = [2, 0], sizes = [1, 512], strides = [1, 1]} : vector<9x512xf32> to vector<1x512xf32>
    %123 = vector.broadcast %122 : vector<1x512xf32> to vector<4x512xf32>
    %124 = arith.mulf %121, %123 : vector<4x512xf32>
    %cst_36 = arith.constant 0.000000e+00 : f32
    %125 = vector.broadcast %cst_36 : f32 to vector<4x1xf32>
    %126 = vector.extract_strided_slice %104 {offsets = [0, 0], sizes = [4, 511], strides = [1, 1]} : vector<4x512xf32> to vector<4x511xf32>
    %127 = tpu.concatenate %125, %126 in 1 : vector<4x1xf32>, vector<4x511xf32> -> vector<4x512xf32>
    %128 = vector.extract_strided_slice %1 {offsets = [3, 0], sizes = [1, 512], strides = [1, 1]} : vector<9x512xf32> to vector<1x512xf32>
    %129 = vector.broadcast %128 : vector<1x512xf32> to vector<4x512xf32>
    %130 = arith.mulf %127, %129 : vector<4x512xf32>
    %131 = vector.extract_strided_slice %104 {offsets = [0, 1], sizes = [4, 511], strides = [1, 1]} : vector<4x512xf32> to vector<4x511xf32>
    %cst_37 = arith.constant 0.000000e+00 : f32
    %132 = vector.broadcast %cst_37 : f32 to vector<4x1xf32>
    %133 = tpu.concatenate %131, %132 in 1 : vector<4x511xf32>, vector<4x1xf32> -> vector<4x512xf32>
    %134 = vector.extract_strided_slice %1 {offsets = [5, 0], sizes = [1, 512], strides = [1, 1]} : vector<9x512xf32> to vector<1x512xf32>
    %135 = vector.broadcast %134 : vector<1x512xf32> to vector<4x512xf32>
    %136 = arith.mulf %133, %135 : vector<4x512xf32>
    %137 = vector.extract_strided_slice %104 {offsets = [0, 15], sizes = [4, 497], strides = [1, 1]} : vector<4x512xf32> to vector<4x497xf32>
    %cst_38 = arith.constant 0.000000e+00 : f32
    %138 = vector.broadcast %cst_38 : f32 to vector<4x15xf32>
    %139 = tpu.concatenate %137, %138 in 1 : vector<4x497xf32>, vector<4x15xf32> -> vector<4x512xf32>
    %140 = vector.extract_strided_slice %1 {offsets = [6, 0], sizes = [1, 512], strides = [1, 1]} : vector<9x512xf32> to vector<1x512xf32>
    %141 = vector.broadcast %140 : vector<1x512xf32> to vector<4x512xf32>
    %142 = arith.mulf %139, %141 : vector<4x512xf32>
    %143 = vector.extract_strided_slice %104 {offsets = [0, 16], sizes = [4, 496], strides = [1, 1]} : vector<4x512xf32> to vector<4x496xf32>
    %cst_39 = arith.constant 0.000000e+00 : f32
    %144 = vector.broadcast %cst_39 : f32 to vector<4x16xf32>
    %145 = tpu.concatenate %143, %144 in 1 : vector<4x496xf32>, vector<4x16xf32> -> vector<4x512xf32>
    %146 = vector.extract_strided_slice %1 {offsets = [7, 0], sizes = [1, 512], strides = [1, 1]} : vector<9x512xf32> to vector<1x512xf32>
    %147 = vector.broadcast %146 : vector<1x512xf32> to vector<4x512xf32>
    %148 = arith.mulf %145, %147 : vector<4x512xf32>
    %149 = vector.extract_strided_slice %104 {offsets = [0, 17], sizes = [4, 495], strides = [1, 1]} : vector<4x512xf32> to vector<4x495xf32>
    %cst_40 = arith.constant 0.000000e+00 : f32
    %150 = vector.broadcast %cst_40 : f32 to vector<4x17xf32>
    %151 = tpu.concatenate %149, %150 in 1 : vector<4x495xf32>, vector<4x17xf32> -> vector<4x512xf32>
    %152 = vector.extract_strided_slice %1 {offsets = [8, 0], sizes = [1, 512], strides = [1, 1]} : vector<9x512xf32> to vector<1x512xf32>
    %153 = vector.broadcast %152 : vector<1x512xf32> to vector<4x512xf32>
    %154 = arith.mulf %151, %153 : vector<4x512xf32>
    %155 = tpu.concatenate %112, %118, %124, %130, %104, %136, %142, %148, %154 in 0 : vector<4x512xf32>, vector<4x512xf32>, vector<4x512xf32>, vector<4x512xf32>, vector<4x512xf32>, vector<4x512xf32>, vector<4x512xf32>, vector<4x512xf32>, vector<4x512xf32> -> vector<36x512xf32>
    %cst_41 = arith.constant dense<0.000000e+00> : vector<4x512xf32>
    %156 = tpu.matmul %105, %155, %cst_41 {dimension_numbers = #tpu.dot_dimension_numbers<[1], [0], [0], [1], [0, 0, 1, 1], [], []>} : vector<4x36xf32>, vector<36x512xf32>, vector<4x512xf32> -> vector<4x512xf32>
    %157 = vector.broadcast %106 : vector<4x1xf32> to vector<4x512xf32>
    %158 = arith.addf %156, %157 : vector<4x512xf32>
    %cst_42 = arith.constant 0.000000e+00 : f32
    %159 = vector.broadcast %cst_42 : f32 to vector<4x512xf32>
    %160 = arith.maximumf %158, %159 : vector<4x512xf32>
    %161 = vector.extract_strided_slice %160 {offsets = [0, 0], sizes = [4, 256], strides = [1, 1]} : vector<4x512xf32> to vector<4x256xf32>
    %c0_43 = arith.constant 0 : index
    %c0_44 = arith.constant 0 : index
    %c0_45 = arith.constant 0 : index
    %162 = vector.load %arg9[%c0_43, %c0_44, %c0_45] : memref<2x4x256xf32, #tpu.memory_space<vmem>>, vector<1x4x256xf32>
    %163 = vector.shape_cast %162 : vector<1x4x256xf32> to vector<4x256xf32>
    %164 = vector.shape_cast %161 : vector<4x256xf32> to vector<1x4x256xf32>
    tpu.vector_store %arg9[%c0_43, %c0_44, %c0_45], %164 {strides = array<i32>} : memref<2x4x256xf32, #tpu.memory_space<vmem>>, vector<1x4x256xf32>,
    %165 = vector.extract_strided_slice %160 {offsets = [0, 256], sizes = [4, 256], strides = [1, 1]} : vector<4x512xf32> to vector<4x256xf32>
    %c1_46 = arith.constant 1 : index
    %c0_47 = arith.constant 0 : index
    %c0_48 = arith.constant 0 : index
    %166 = vector.load %arg9[%c1_46, %c0_47, %c0_48] : memref<2x4x256xf32, #tpu.memory_space<vmem>>, vector<1x4x256xf32>
    %167 = vector.shape_cast %166 : vector<1x4x256xf32> to vector<4x256xf32>
    %168 = vector.shape_cast %165 : vector<4x256xf32> to vector<1x4x256xf32>
    tpu.vector_store %arg9[%c1_46, %c0_47, %c0_48], %168 {strides = array<i32>} : memref<2x4x256xf32, #tpu.memory_space<vmem>>, vector<1x4x256xf32>,
    return
  }
  func.func @transform_0(%arg0: i32) -> (i32, i32, i32) {
    %c0_i32 = arith.constant 0 : i32
    %c0_i32_0 = arith.constant 0 : i32
    %c0_i32_1 = arith.constant 0 : i32
    return %arg0, %c0_i32, %c0_i32_0 : i32, i32, i32
  }
  func.func @transform_1(%arg0: i32) -> (i32, i32, i32) {
    %c0_i32 = arith.constant 0 : i32
    %c0_i32_0 = arith.constant 0 : i32
    %c0_i32_1 = arith.constant 0 : i32
    return %arg0, %c0_i32, %c0_i32_0 : i32, i32, i32
  }
  func.func @transform_2(%arg0: i32) -> (i32, i32) {
    %c0_i32 = arith.constant 0 : i32
    %c0_i32_0 = arith.constant 0 : i32
    %c0_i32_1 = arith.constant 0 : i32
    return %c0_i32, %c0_i32_0 : i32, i32
  }
  func.func @transform_3(%arg0: i32) -> (i32, i32) {
    %c0_i32 = arith.constant 0 : i32
    %c0_i32_0 = arith.constant 0 : i32
    %c0_i32_1 = arith.constant 0 : i32
    return %c0_i32, %c0_i32_0 : i32, i32
  }
  func.func @transform_4(%arg0: i32) -> (i32, i32) {
    %c0_i32 = arith.constant 0 : i32
    %c0_i32_0 = arith.constant 0 : i32
    %c0_i32_1 = arith.constant 0 : i32
    return %c0_i32, %c0_i32_0 : i32, i32
  }
  func.func @transform_5(%arg0: i32) -> (i32, i32) {
    %c0_i32 = arith.constant 0 : i32
    %c0_i32_0 = arith.constant 0 : i32
    %c0_i32_1 = arith.constant 0 : i32
    return %c0_i32, %c0_i32_0 : i32, i32
  }
  func.func @transform_6(%arg0: i32) -> (i32, i32) {
    %c0_i32 = arith.constant 0 : i32
    %c0_i32_0 = arith.constant 0 : i32
    %c0_i32_1 = arith.constant 0 : i32
    return %c0_i32, %c0_i32_0 : i32, i32
  }
  func.func @transform_7(%arg0: i32) -> (i32, i32) {
    %c0_i32 = arith.constant 0 : i32
    %c0_i32_0 = arith.constant 0 : i32
    %c0_i32_1 = arith.constant 0 : i32
    return %c0_i32, %c0_i32_0 : i32, i32
  }
  func.func @transform_8(%arg0: i32) -> (i32, i32, i32) {
    %c0_i32 = arith.constant 0 : i32
    %c0_i32_0 = arith.constant 0 : i32
    %c0_i32_1 = arith.constant 0 : i32
    return %arg0, %c0_i32, %c0_i32_0 : i32, i32, i32
  }
}

</mosaic_0001>

<bundles_post_ra>
// kernel: decoder_block_forward.1
= control target key start
LH: loop header
LB: loop body
LE: loop exit
PB: predicated region body
PF: predicated region fallthrough
CT: control target
= control target key end

     0   :  { %s1085_s15 = smov 86   ;;  %s1086_s16 = smov 46   ;;  %vm54_vm0 = vcmask 523264   ;;  %vm194_vm1 = vcmask 130048   ;;  %vm196_vm2 = vcmask 261120   ;;  %vm128_vm3 = vcmask 572416   ;;  %s1866_s1 = inlined_call_operand.vmem [shape: f32[2,4,400], index: 1, kind: input, shape index: {}]   ;;  %s1867_s2 = inlined_call_operand.vmem [shape: f32[64,256], index: 2, kind: input, shape index: {}]   ;;  %s1868_s0 = inlined_call_operand.vmem [shape: f32[2,4,64], index: 0, kind: input, shape index: {}]   ;;  %s1869_s3 = inlined_call_operand.vmem [shape: f32[9,512], index: 3, kind: input, shape index: {}]   ;;  %s1870_s5 = inlined_call_operand.vmem [shape: f32[4,1], index: 5, kind: input, shape index: {}]   ;;  %s1871_s4 = inlined_call_operand.vmem [shape: f32[4,72], index: 4, kind: input, shape index: {}]   ;;  %s1872_s7 = inlined_call_operand.vmem [shape: f32[4,1], index: 7, kind: input, shape index: {}]   ;;  %s1873_s6 = inlined_call_operand.vmem [shape: f32[4,36], index: 6, kind: input, shape index: {}]   ;;  %s1874_s8 = inlined_call_operand.vmem [shape: f32[2,4,256], index: 8, kind: output, shape index: {}]  }
   0x1   :  { %v1158_v0 = vld [vmem:[%s1866_s1] sm:$0xff]  ;;  %v43_v1 = vld [vmem:[%s1867_s2 + $0x70] sm:$0xff]  ;;  %v1170_v3 = vld [vmem:[%s1866_s1 + $0x8] sm:$0xff]  ;;  %s1087_s21 = smov 82   ;;  %s1088_s30 = smov 78   ;;  %vm198_vm4 = vcmask 392192  }
   0x2   :  { %v41_v2 = vld [vmem:[%s1867_s2 + $0x60] sm:$0xff]  ;;  %101 = vst [vmem:[#allocation1] ss:$2 sm:$0xff] %v1158_v0  ;;  %66 = vmatpush.msra.mxu0 %v43_v1  ;;  %236 = vmatpush.msra.mxu2 %v43_v1  ;;  %v1176_v4 = vld [vmem:[%s1866_s1 + $0x18] sm:$0xff]  ;;  %v39_v7 = vld [vmem:[%s1867_s2 + $0x50] sm:$0xff]  ;;  %s1089_s11 = smov 74  }
   0x3   :  { %159 = vst [vmem:[#allocation1 + $0x10] ss:$2 sm:$0xff] %v1170_v3  ;;  %v37_v10 = vld [vmem:[%s1867_s2 + $0x40] sm:$0xff]  ;;  %v35_v11 = vld [vmem:[%s1867_s2 + $0x30] sm:$0xff]  ;;  %s1090_s12 = smov 70   ;;  %s1091_s13 = smov 66  }
   0x4   :  { %67 = vmatpush.msra.mxu0 %v41_v2  ;;  %237 = vmatpush.msra.mxu2 %v41_v2  ;;  %v33_v12 = vld [vmem:[%s1867_s2 + $0x20] sm:$0xff]  ;;  %v31_v13 = vld [vmem:[%s1867_s2 + $0x10] sm:$0xff]  ;;  %s1092_s14 = smov 62   ;;  %s1093_s17 = smov 58   ;;  %v44_v23 = vld [vmem:[%s1867_s2 + $0x78] sm:$0xff]  ;;  %vm201_vm5 = vcmask 654336  }
   0x5   :  { %v29_v15 = vld [vmem:[%s1867_s2] sm:$0xff]  ;;  %86 = vmatpush.msra.mxu1 %v44_v23  ;;  %256 = vmatpush.msra.mxu3 %v44_v23  ;;  %v42_v24 = vld [vmem:[%s1867_s2 + $0x68] sm:$0xff]  ;;  %s1094_s23 = smov 54   ;;  %v40_v26 = vld [vmem:[%s1867_s2 + $0x58] sm:$0xff]  ;;  %s1095_s18 = smov 50   ;;  %vm203_vm6 = vcmask 785408  }
   0x6   :  { %68 = vmatpush.msra.mxu0 %v39_v7  ;;  %238 = vmatpush.msra.mxu2 %v39_v7  ;;  %v53_v16 = vld [vmem:[%s1868_s0] sm:$0xf]  ;;  %v38_v27 = vld [vmem:[%s1867_s2 + $0x48] sm:$0xff]  ;;  %v36_v28 = vld [vmem:[%s1867_s2 + $0x38] sm:$0xff]  ;;  %s1096_s25 = smov 42   ;;  %s1098_s28 = smov 34  }
   0x7   :  { %87 = vmatpush.msra.mxu1 %v42_v24  ;;  %257 = vmatpush.msra.mxu3 %v42_v24  ;;  %v34_v29 = vld [vmem:[%s1867_s2 + $0x28] sm:$0xff]  ;;  %v32_v31 = vld [vmem:[%s1867_s2 + $0x18] sm:$0xff]  ;;  %v1036_v36 = vld [vmem:[%s1868_s0 + $0x4] sm:$0xf]  ;;  %s1099_s29 = smov 30   ;;  %s1100_s0 = smov 26  }
   0x8   :  { %69 = vmatpush.msra.mxu0 %v37_v10  ;;  %239 = vmatpush.msra.mxu2 %v37_v10  ;;  %v30_v32 = vld [vmem:[%s1867_s2 + $0x8] sm:$0xff]  ;;  %s1097_s2 = smov 38   ;;  %v1267_v39 = vld [vmem:[%s1866_s1 + $0x10] sm:$0xff]  ;;  %vm205_vm7 = vcmask 916480   ;;  %vm220_vm8 = vcmask 1043456   ;;  %s1101_s1 = smov 111  }
   0x9   :  { %v102_v5 = vld.sshfl [vmem:[#allocation1] sm:$0xff pattern:$0x75316420]  ;;  %88 = vmatpush.msra.mxu1 %v40_v26  ;;  %258 = vmatpush.msra.mxu3 %v40_v26  ;;  %vm166_vm9 = vcmask 375808   ;;  %vm572_vm10 = vcmask 908288   ;;  %vm523_vm11 = vcmask 924672  }
   0xa   :  { %103 = vrot.lane.b32.xlu1 %v102_v5, %s1085_s15  ;;  %106 = vst [vmem:[#allocation1] ss:$2 sm:$0xff] %v1158_v0  ;;  %v161_v6 = vld.sshfl [vmem:[#allocation1 + $0x10] sm:$0xff pattern:$0x75316420]  ;;  %70 = vmatpush.msra.mxu0 %v35_v11  ;;  %vm498_vm12 = vcmask 1039360  }
   0xb   :  { %329 = vst [vmem:[#allocation1 + $0x10] ss:$2 sm:$0xff] %v1176_v4  ;;  %164 = vrot.lane.b32.xlu0 %v161_v6, %s1086_s16  ;;  %240 = vmatpush.msra.mxu2 %v35_v11  ;;  %vm473_vm13 = vcmask 7168   ;;  %vm448_vm14 = vcmask 121856   ;;  %vm399_vm15 = vcmask 138240  }
   0xc   :  { %71 = vmatpush.msra.mxu0 %v33_v12  ;;  %89 = vmatpush.msra.mxu1 %v38_v27 }
   0xd   :  { %241 = vmatpush.msra.mxu2 %v33_v12  ;;  %259 = vmatpush.msra.mxu3 %v38_v27 }
   0xe   :  { %72 = vmatpush.msra.mxu0 %v31_v13  ;;  %90 = vmatpush.msra.mxu1 %v36_v28 }
   0xf   :  { %242 = vmatpush.msra.mxu2 %v31_v13  ;;  %260 = vmatpush.msra.mxu3 %v36_v28 }
  0x10   :  { %73 = vmatpush.msra.mxu0 %v29_v15  ;;  %91 = vmatpush.msra.mxu1 %v34_v29 }
  0x11   :  { %v107_v8 = vld.sshfl [vmem:[#allocation1] sm:$0xff pattern:$0x75316420]  ;;  %1034 = vmatmul.msk.f32.vlgmr.msra.gmra.mxu0 %vm54_vm0, %v53_v16  ;;  %243 = vmatpush.msra.mxu2 %v29_v15 }
  0x12   :  { %v331_v9 = vld.sshfl [vmem:[#allocation1 + $0x10] sm:$0xff pattern:$0x75316420]  ;;  %111 = vst [vmem:[#allocation1] ss:$2 sm:$0xff] %v1158_v0  ;;  %108 = vrot.lane.b32.xlu2 %v107_v8, %s1087_s21  ;;  %261 = vmatpush.msra.mxu3 %v34_v29 }
  0x13   :  { %334 = vrot.lane.b32.xlu1 %v331_v9, %s1086_s16  ;;  %92 = vmatpush.msra.mxu1 %v32_v31 }
  0x14   :  { %262 = vmatpush.msra.mxu3 %v32_v31  ;;  %1037 = vmatmul.msk.f32.vlgmr.msra.gmra.mxu2 %vm54_vm0, %v1036_v36 }
  0x15   :  { %93 = vmatpush.msra.mxu1 %v30_v32 }
  0x16   :  { %263 = vmatpush.msra.mxu3 %v30_v32  ;;  %1035 = vmatmul.msk.f32.vlgmr.msra.gmra.mxu1 %vm54_vm0, %v53_v16 }
  0x17   :  { %1038 = vmatmul.msk.f32.vlgmr.msra.gmra.mxu3 %vm54_vm0, %v1036_v36 }
  0x19   :  { %v112_v14 = vld.sshfl [vmem:[#allocation1] sm:$0xff pattern:$0x75316420] }
  0x1a   :  { %116 = vst [vmem:[#allocation1] ss:$2 sm:$0xff] %v1158_v0 }
  0x1b   :  { %113 = vrot.lane.b32.xlu1 %v112_v14, %s1088_s30 }
  0x21   :  { %v117_v17 = vld.sshfl [vmem:[#allocation1] sm:$0xff pattern:$0x75316420] }
  0x22   :  { %121 = vst [vmem:[#allocation1] ss:$2 sm:$0xff] %v1158_v0  ;;  %118 = vrot.lane.b32.xlu0 %v117_v17, %s1089_s11 }
  0x29   :  { %v122_v18 = vld.sshfl [vmem:[#allocation1] sm:$0xff pattern:$0x75316420]  ;;  %v123_v19 = vld.sshfl [vmem:[#allocation1 + $0x8] sm:$0xff pattern:$0x75316420] }
  0x2a   :  { %131 = vst [vmem:[#allocation1] ss:$2 sm:$0xff] %v1158_v0  ;;  %124 = vrot.lane.b32.xlu1 %v122_v18, %s1090_s12  ;;  %126 = vrot.lane.b32.xlu2 %v123_v19, %s1090_s12 }
  0x31   :  { %v132_v20 = vld.sshfl [vmem:[#allocation1 + $0x8] sm:$0xff pattern:$0x75316420] }
  0x32   :  { %136 = vst [vmem:[#allocation1] ss:$2 sm:$0xff] %v1158_v0  ;;  %133 = vrot.lane.b32.xlu2 %v132_v20, %s1091_s13 }
  0x39   :  { %v137_v21 = vld.sshfl [vmem:[#allocation1 + $0x8] sm:$0xff pattern:$0x75316420] }
  0x3a   :  { %141 = vst [vmem:[#allocation1] ss:$2 sm:$0xff] %v1158_v0  ;;  %138 = vrot.lane.b32.xlu1 %v137_v21, %s1092_s14 }
  0x41   :  { %v142_v22 = vld.sshfl [vmem:[#allocation1 + $0x8] sm:$0xff pattern:$0x75316420] }
  0x42   :  { %146 = vst [vmem:[#allocation1] ss:$2 sm:$0xff] %v1158_v0  ;;  %143 = vrot.lane.b32.xlu2 %v142_v22, %s1093_s17 }
  0x49   :  { %v147_v25 = vld.sshfl [vmem:[#allocation1 + $0x8] sm:$0xff pattern:$0x75316420] }
  0x4a   :  { %151 = vst [vmem:[#allocation1] ss:$2 sm:$0xff] %v1158_v0  ;;  %148 = vrot.lane.b32.xlu0 %v147_v25, %s1094_s23 }
  0x51   :  { %v152_v30 = vld.sshfl [vmem:[#allocation1 + $0x8] sm:$0xff pattern:$0x75316420] }
  0x52   :  { %157 = vst [vmem:[#allocation1] ss:$2 sm:$0xff] %v1158_v0  ;;  %153 = vrot.lane.b32.xlu1 %v152_v30, %s1095_s18 }
  0x59   :  { %v160_v33 = vld.sshfl [vmem:[#allocation1 + $0x8] sm:$0xff pattern:$0x75316420] }
  0x5a   :  { %169 = vst [vmem:[#allocation1] ss:$2 sm:$0xff] %v1170_v3  ;;  %162 = vrot.lane.b32.xlu2 %v160_v33, %s1086_s16 }
  0x61   :  { %v170_v34 = vld.sshfl [vmem:[#allocation1] sm:$0xff pattern:$0x75316420] }
  0x62   :  { %174 = vst [vmem:[#allocation1] ss:$2 sm:$0xff] %v1170_v3  ;;  %171 = vrot.lane.b32.xlu0 %v170_v34, %s1096_s25 }
  0x69   :  { %v175_v35 = vld.sshfl [vmem:[#allocation1] sm:$0xff pattern:$0x75316420] }
  0x6a   :  { %179 = vst [vmem:[#allocation1] ss:$2 sm:$0xff] %v1170_v3  ;;  %176 = vrot.lane.b32.xlu2 %v175_v35, %s1097_s2 }
  0x6c   :  { %v109_v43 = vpop.permute.xlu2 %108 }
  0x71   :  { %v180_v37 = vld.sshfl [vmem:[#allocation1] sm:$0xff pattern:$0x75316420] }
  0x72   :  { %181 = vrot.lane.b32.xlu0 %v180_v37, %s1098_s28  ;;  %184 = vst [vmem:[#allocation1] ss:$2 sm:$0xff] %v1170_v3 }
  0x79   :  { %v185_v38 = vld.sshfl [vmem:[#allocation1] sm:$0xff pattern:$0x75316420] }
  0x7a   :  { %186 = vrot.lane.b32.xlu1 %v185_v38, %s1099_s29  ;;  %189 = vst [vmem:[#allocation1] ss:$2 sm:$0xff] %v1170_v3 }
  0x7c   :  { %v104_v41 = vpop.permute.xlu1 %103 }
  0x7d   :  { %v1277_v47 = vpop.permute.xlu0 %164  ;;  %v195_v50 = vsel %vm194_vm1, %v104_v41, %v109_v43 }
  0x81   :  { %v190_v40 = vld.sshfl [vmem:[#allocation1] sm:$0xff pattern:$0x75316420] }
  0x82   :  { %191 = vrot.lane.b32.xlu0 %v190_v40, %s1100_s0  ;;  %272 = vst [vmem:[#allocation1] ss:$2 sm:$0xff] %v1267_v39 }
  0x84   :  { %v127_v46 = vpop.permute.xlu2 %126 }
  0x85   :  { %v1273_v44 = vpop.permute.xlu1 %334 }
  0x89   :  { %v273_v42 = vld.sshfl [vmem:[#allocation1] sm:$0xff pattern:$0x75316420] }
  0x8a   :  { %277 = vst [vmem:[#allocation1] ss:$2 sm:$0xff] %v1267_v39  ;;  %274 = vrot.lane.b32.xlu2 %v273_v42, %s1085_s15  ;;  %s1102_s15 = smov 112  }
  0x8c   :  { %v134_v52 = vpop.permute.xlu2 %133 }
  0x8d   :  { %v114_v48 = vpop.permute.xlu1 %113 }
  0x8e   :  { %v197_v51 = vsel %vm196_vm2, %v195_v50, %v114_v48  ;;  %v75_v59 = vpop.f32.mrf.mxu0 }
  0x8f   :  { %v216_v63 = vrot.slane %v75_v59, 4 }
  0x91   :  { %v278_v45 = vld.sshfl [vmem:[#allocation1] sm:$0xff pattern:$0x75316420] }
  0x92   :  { %282 = vst [vmem:[#allocation1] ss:$2 sm:$0xff] %v1267_v39  ;;  %279 = vrot.lane.b32.xlu2 %v278_v45, %s1087_s21  ;;  %s1104_s21 = smov 15  }
  0x93   :  { %v95_v24 = vpop.f32.mrf.mxu1 }
  0x94   :  { %v119_v54 = vpop.permute.xlu0 %118  ;;  %v217_v28 = vrot.slane %v95_v24, 4 }
  0x95   :  { %v199_v57 = vsel %vm198_vm4, %v197_v51, %v119_v54 }
  0x97   :  { %v245_v48 = vpop.f32.mrf.mxu2 }
  0x98   :  { %v379_v50 = vrot.slane %v245_v48, 4  ;;  %v1481_v48 = vld [vmem:[%s1869_s3 + $0x18] sm:$0xff] }
  0x99   :  { %v283_v49 = vld.sshfl [vmem:[#allocation1] sm:$0xff pattern:$0x75316420] }
  0x9a   :  { %284 = vrot.lane.b32.xlu1 %v283_v49, %s1088_s30  ;;  %287 = vst [vmem:[#allocation1] ss:$2 sm:$0xff] %v1267_v39  ;;  %s1105_s30 = smov 16  }
  0x9c   :  { %v125_v55 = vpop.permute.xlu1 %124  ;;  %v144_v0 = vpop.permute.xlu2 %143 }
  0x9d   :  { %v129_v56 = vsel %vm128_vm3, %v125_v55, %v127_v46 }
  0x9e   :  { %v200_v58 = vsel %vm54_vm0, %v199_v57, %v129_v56 }
  0x9f   :  { %v202_v62 = vsel %vm201_vm5, %v200_v58, %v134_v52 }
  0xa1   :  { %v288_v53 = vld.sshfl [vmem:[#allocation1] sm:$0xff pattern:$0x75316420] }
  0xa2   :  { %292 = vst [vmem:[#allocation1] ss:$2 sm:$0xff] %v1267_v39  ;;  %289 = vrot.lane.b32.xlu0 %v288_v53, %s1089_s11  ;;  %s1106_s11 = smov 113  }
  0xa9   :  { %v293_v60 = vld.sshfl [vmem:[#allocation1] sm:$0xff pattern:$0x75316420]  ;;  %v294_v61 = vld.sshfl [vmem:[#allocation1 + $0x8] sm:$0xff pattern:$0x75316420] }
  0xaa   :  { %295 = vrot.lane.b32.xlu1 %v293_v60, %s1090_s12  ;;  %301 = vst [vmem:[#allocation1] ss:$2 sm:$0xff] %v1267_v39  ;;  %297 = vrot.lane.b32.xlu2 %v294_v61, %s1090_s12  ;;  %s1107_s12 = smov 127  }
  0xac   :  { %v139_v1 = vpop.permute.xlu1 %138 }
  0xad   :  { %v204_v2 = vsel %vm203_vm6, %v202_v62, %v139_v1  ;;  %v1376_v62 = vld [vmem:[%s1869_s3 + $0x20] ss:$0 sm:$0xff] }
  0xae   :  { %v206_v3 = vsel %vm205_vm7, %v204_v2, %v144_v0 }
  0xaf   :  { %v1295_v5 = vsel %vm220_vm8, %v206_v3, %v216_v63 }
  0xb0   :  { %564 = vrot.lane.b32.xlu0 %v1295_v5, %s1101_s1 }
  0xb1   :  { %v302_v6 = vld.sshfl [vmem:[#allocation1 + $0x8] sm:$0xff pattern:$0x75316420] }
  0xb2   :  { %306 = vst [vmem:[#allocation1] ss:$2 sm:$0xff] %v1267_v39  ;;  %303 = vrot.lane.b32.xlu2 %v302_v6, %s1091_s13  ;;  %s1108_s13 = smov 17  }
  0xb4   :  { %v163_v15 = vpop.permute.xlu2 %162 }
  0xb5   :  { %v167_v19 = vsel %vm166_vm9, %v163_v15, %v1277_v47 }
  0xb9   :  { %v307_v7 = vld.sshfl [vmem:[#allocation1 + $0x8] sm:$0xff pattern:$0x75316420] }
  0xba   :  { %308 = vrot.lane.b32.xlu1 %v307_v7, %s1092_s14  ;;  %311 = vst [vmem:[#allocation1] ss:$2 sm:$0xff] %v1267_v39 }
  0xbc   :  { %v149_v12 = vpop.permute.xlu0 %148 }
  0xc1   :  { %v312_v8 = vld.sshfl [vmem:[#allocation1 + $0x8] sm:$0xff pattern:$0x75316420] }
  0xc2   :  { %316 = vst [vmem:[#allocation1] ss:$2 sm:$0xff] %v1267_v39  ;;  %313 = vrot.lane.b32.xlu2 %v312_v8, %s1093_s17 }
  0xc4   :  { %v154_v16 = vpop.permute.xlu1 %153  ;;  %v177_v23 = vpop.permute.xlu2 %176 }
  0xc5   :  { %v207_v18 = vsel %vm194_vm1, %v149_v12, %v154_v16 }
  0xc6   :  { %v208_v21 = vsel %vm196_vm2, %v207_v18, %v167_v19 }
  0xc9   :  { %v317_v9 = vld.sshfl [vmem:[#allocation1 + $0x8] sm:$0xff pattern:$0x75316420] }
  0xca   :  { %321 = vst [vmem:[#allocation1] ss:$2 sm:$0xff] %v1267_v39  ;;  %318 = vrot.lane.b32.xlu0 %v317_v9, %s1094_s23 }
  0xd1   :  { %v322_v10 = vld.sshfl [vmem:[#allocation1 + $0x8] sm:$0xff pattern:$0x75316420] }
  0xd2   :  { %327 = vst [vmem:[#allocation1] ss:$2 sm:$0xff] %v1267_v39  ;;  %323 = vrot.lane.b32.xlu0 %v322_v10, %s1095_s18  ;;  %v265_v10 = vpop.f32.mrf.mxu3 }
  0xd4   :  { %v172_v14 = vpop.permute.xlu0 %171 }
  0xd5   :  { %v209_v22 = vsel %vm198_vm4, %v208_v21, %v172_v14 }
  0xd6   :  { %v210_v27 = vsel %vm54_vm0, %v209_v22, %v177_v23 }
  0xd9   :  { %v330_v11 = vld.sshfl [vmem:[#allocation1 + $0x8] sm:$0xff pattern:$0x75316420] }
  0xda   :  { %332 = vrot.lane.b32.xlu1 %v330_v11, %s1086_s16  ;;  %338 = vst [vmem:[#allocation1] ss:$2 sm:$0xff] %v1176_v4  ;;  %s1103_s16 = smov 1  }
  0xe1   :  { %v339_v13 = vld.sshfl [vmem:[#allocation1] sm:$0xff pattern:$0x75316420] }
  0xe2   :  { %340 = vrot.lane.b32.xlu0 %v339_v13, %s1096_s25  ;;  %343 = vst [vmem:[#allocation1] ss:$2 sm:$0xff] %v1176_v4  ;;  %v380_v13 = vrot.slane %v265_v10, 4 }
  0xe4   :  { %v182_v20 = vpop.permute.xlu0 %181  ;;  %v275_v36 = vpop.permute.xlu2 %274 }
  0xe5   :  { %v211_v29 = vsel %vm201_vm5, %v210_v27, %v182_v20  ;;  %v1411_v20 = vld [vmem:[%s1869_s3 + $0x28] ss:$0 sm:$0xff] }
  0xe6   :  { %v1441_v27 = vld [vmem:[%s1869_s3 + $0x8] sm:$0xff] }
  0xe9   :  { %v344_v17 = vld.sshfl [vmem:[#allocation1] sm:$0xff pattern:$0x75316420] }
  0xea   :  { %345 = vrot.lane.b32.xlu2 %v344_v17, %s1097_s2  ;;  %348 = vst [vmem:[#allocation1] ss:$2 sm:$0xff] %v1176_v4 }
  0xec   :  { %v187_v25 = vpop.permute.xlu1 %186  ;;  %v280_v37 = vpop.permute.xlu2 %279 }
  0xed   :  { %v212_v30 = vsel %vm203_vm6, %v211_v29, %v187_v25  ;;  %v363_v39 = vsel %vm194_vm1, %v275_v36, %v280_v37  ;;  %v557_v29 = vperm.slane %v1441_v27, 7 }
  0xf1   :  { %v349_v26 = vld.sshfl [vmem:[#allocation1] sm:$0xff pattern:$0x75316420] }
  0xf2   :  { %353 = vst [vmem:[#allocation1] ss:$2 sm:$0xff] %v1176_v4  ;;  %350 = vrot.lane.b32.xlu0 %v349_v26, %s1098_s28  ;;  %v1436_v26 = vld [vmem:[%s1869_s3] sm:$0xff] }
  0xf4   :  { %v192_v31 = vpop.permute.xlu0 %191 }
  0xf5   :  { %v213_v32 = vsel %vm205_vm7, %v212_v30, %v192_v31 }
  0xf6   :  { %v1327_v33 = vsel %vm220_vm8, %v213_v32, %v217_v28  ;;  %v556_v28 = vperm.slane %v1436_v26, 7 }
  0xf7   :  { %542 = vrot.lane.b32.xlu2 %v1327_v33, %s1102_s15  ;;  %566 = vrot.lane.b32.xlu1 %v1327_v33, %s1101_s1 }
  0xf9   :  { %v354_v34 = vld.sshfl [vmem:[#allocation1] sm:$0xff pattern:$0x75316420] }
  0xfa   :  { %358 = vst [vmem:[#allocation1] ss:$2 sm:$0xff] %v1176_v4  ;;  %467 = vrot.lane.b32.xlu0 %v1327_v33, %s1103_s16 }
  0xff   :  { %442 = vrot.lane.b32.xlu1 %v1327_v33, %s1104_s21 }
 0x101   :  { %v359_v35 = vld.sshfl [vmem:[#allocation1] sm:$0xff pattern:$0x75316420] }
 0x102   :  { %360 = vrot.lane.b32.xlu0 %v359_v35, %s1100_s0 }
 0x104   :  { %v298_v4 = vpop.permute.xlu2 %297 }
 0x107   :  { %355 = vrot.lane.b32.xlu1 %v354_v34, %s1099_s29 }
 0x10a   :  { %418 = vrot.lane.b32.xlu0 %v1327_v33, %s1105_s30 }
 0x10c   :  { %v285_v38 = vpop.permute.xlu1 %284  ;;  %v304_v41 = vpop.permute.xlu2 %303 }
 0x10d   :  { %v364_v40 = vsel %vm196_vm2, %v363_v39, %v285_v38 }
 0x114   :  { %v290_v43 = vpop.permute.xlu0 %289 }
 0x115   :  { %v365_v46 = vsel %vm198_vm4, %v364_v40, %v290_v43  ;;  %v1466_v43 = vld [vmem:[%s1869_s3 + $0x30] ss:$0 sm:$0xff] }
 0x11c   :  { %v296_v42 = vpop.permute.xlu1 %295  ;;  %v314_v51 = vpop.permute.xlu2 %313 }
 0x11d   :  { %v299_v45 = vsel %vm128_vm3, %v296_v42, %v298_v4 }
 0x11e   :  { %v366_v47 = vsel %vm54_vm0, %v365_v46, %v299_v45  ;;  %v1471_v45 = vld [vmem:[%s1869_s3 + $0x38] ss:$0 sm:$0xff] }
 0x11f   :  { %v367_v49 = vsel %vm201_vm5, %v366_v47, %v304_v41  ;;  %v1476_v47 = vld [vmem:[%s1869_s3 + $0x10] sm:$0xff] }
 0x122   :  { %v565_v56 = vpop.permute.xlu0 %564 }
 0x12c   :  { %v309_v52 = vpop.permute.xlu1 %308 }
 0x12d   :  { %v368_v53 = vsel %vm203_vm6, %v367_v49, %v309_v52 }
 0x12e   :  { %v369_v54 = vsel %vm205_vm7, %v368_v53, %v314_v51  ;;  %v559_v51 = vperm.slane %v1481_v48, 7 }
 0x12f   :  { %v1351_v55 = vsel %vm220_vm8, %v369_v54, %v379_v50  ;;  %v558_v50 = vperm.slane %v1476_v47, 7 }
 0x130   :  { %568 = vrot.lane.b32.xlu2 %v1351_v55, %s1101_s1  ;;  %544 = vrot.lane.b32.xlu1 %v1351_v55, %s1102_s15 }
 0x131   :  { %519 = vrot.lane.b32.xlu0 %v1351_v55, %s1106_s11 }
 0x138   :  { %469 = vrot.lane.b32.xlu2 %v1351_v55, %s1103_s16  ;;  %494 = vrot.lane.b32.xlu1 %v1351_v55, %s1107_s12 }
 0x13c   :  { %v319_v57 = vpop.permute.xlu0 %318 }
 0x140   :  { %420 = vrot.lane.b32.xlu2 %v1351_v55, %s1105_s30  ;;  %444 = vrot.lane.b32.xlu1 %v1351_v55, %s1104_s21 }
 0x144   :  { %v324_v58 = vpop.permute.xlu0 %323  ;;  %v346_v11 = vpop.permute.xlu2 %345 }
 0x145   :  { %v370_v6 = vsel %vm194_vm1, %v319_v57, %v324_v58 }
 0x148   :  { %540 = vrot.lane.b32.xlu2 %v1295_v5, %s1102_s15  ;;  %395 = vrot.lane.b32.xlu1 %v1351_v55, %s1108_s13 }
 0x14c   :  { %v333_v60 = vpop.permute.xlu1 %332 }
 0x14d   :  { %v336_v3 = vsel %vm166_vm9, %v333_v60, %v1273_v44 }
 0x14e   :  { %v371_v8 = vsel %vm196_vm2, %v370_v6, %v336_v3  ;;  %vm917_vm2 = vcmask 293888  }
 0x150   :  { %515 = vrot.lane.b32.xlu2 %v1295_v5, %s1106_s11 }
 0x151   :  { %v543_v19 = vpop.permute.xlu2 %542 }
 0x154   :  { %v341_v59 = vpop.permute.xlu0 %340 }
 0x155   :  { %v372_v9 = vsel %vm198_vm4, %v371_v8, %v341_v59 }
 0x156   :  { %v373_v12 = vsel %vm54_vm0, %v372_v9, %v346_v11  ;;  %vm594_vm0 = vcmask 588800  }
 0x164   :  { %v351_v61 = vpop.permute.xlu0 %350 }
 0x165   :  { %v374_v14 = vsel %vm201_vm5, %v373_v12, %v351_v61  ;;  %v508_v12 = vperm.slane %v1441_v27, 5 }
 0x169   :  { %v567_v63 = vpop.permute.xlu1 %566 }
 0x16a   :  { %v573_v0 = vsel %vm572_vm10, %v565_v56, %v567_v63 }
 0x16b   :  { %v585_v1 = vmul.f32 %v1376_v62, %v573_v0  ;;  %v533_v0 = vperm.slane %v1441_v27, 6 }
 0x16c   :  { %v1380_v2 = vpop.permute.xlu0 %467 }
 0x16d   :  { %605 = vmatpush.msrb.mxu0 %v585_v1 }
 0x171   :  { %v1385_v7 = vpop.permute.xlu1 %442 }
 0x174   :  { %v361_v16 = vpop.permute.xlu0 %360 }
 0x179   :  { %v356_v15 = vpop.permute.xlu1 %355 }
 0x17a   :  { %v375_v17 = vsel %vm203_vm6, %v374_v14, %v356_v15  ;;  %v535_v14 = vperm.slane %v1481_v48, 6 }
 0x17b   :  { %v376_v44 = vsel %vm205_vm7, %v375_v17, %v361_v16 }
 0x17c   :  { %v1394_v18 = vsel %vm220_vm8, %v376_v44, %v380_v13  ;;  %v1459_v39 = vpop.permute.xlu0 %418  ;;  %v534_v13 = vperm.slane %v1476_v47, 6 }
 0x17d   :  { %496 = vrot.lane.b32.xlu2 %v1394_v18, %s1107_s12  ;;  %546 = vrot.lane.b32.xlu1 %v1394_v18, %s1102_s15 }
 0x17e   :  { %570 = vrot.lane.b32.xlu0 %v1394_v18, %s1101_s1 }
 0x185   :  { %446 = vrot.lane.b32.xlu2 %v1394_v18, %s1104_s21  ;;  %517 = vrot.lane.b32.xlu1 %v1327_v33, %s1106_s11 }
 0x186   :  { %393 = vrot.lane.b32.xlu0 %v1327_v33, %s1108_s13 }
 0x18a   :  { %v569_v21 = vpop.permute.xlu2 %568 }
 0x18b   :  { %v574_v22 = vsel %vm572_vm10, %v567_v63, %v569_v21  ;;  %v532_v63 = vperm.slane %v1436_v26, 6 }
 0x18c   :  { %v586_v23 = vmul.f32 %v1411_v20, %v574_v22 }
 0x18d   :  { %397 = vrot.lane.b32.xlu2 %v1394_v18, %s1108_s13  ;;  %492 = vrot.lane.b32.xlu1 %v1327_v33, %s1107_s12 }
 0x18e   :  { %521 = vrot.lane.b32.xlu0 %v1394_v18, %s1106_s11  ;;  %625 = vmatpush.msrb.mxu1 %v586_v23 }
 0x192   :  { %v1421_v24 = vpop.permute.xlu2 %469 }
 0x195   :  { %440 = vrot.lane.b32.xlu2 %v1295_v5, %s1104_s21  ;;  %465 = vrot.lane.b32.xlu1 %v1295_v5, %s1103_s16 }
 0x196   :  { %471 = vrot.lane.b32.xlu0 %v1394_v18, %s1103_s16 }
 0x19a   :  { %v1429_v25 = vpop.permute.xlu2 %420 }
 0x19d   :  { %391 = vrot.lane.b32.xlu1 %v1295_v5, %s1108_s13 }
 0x19e   :  { %422 = vrot.lane.b32.xlu0 %v1394_v18, %s1105_s30 }
 0x1a2   :  { %v545_v30 = vpop.permute.xlu1 %544  ;;  %v541_v31 = vpop.permute.xlu2 %540 }
 0x1a3   :  { %v549_v32 = vsel %vm205_vm7, %v543_v19, %v545_v30  ;;  %v548_v34 = vsel %vm205_vm7, %v541_v31, %v543_v19  ;;  %v520_v42 = vpop.permute.xlu0 %519  ;;  %v509_v19 = vperm.slane %v1476_v47, 5 }
 0x1a4   :  { %v560_v35 = vmul.f32 %v556_v28, %v548_v34  ;;  %v561_v36 = vmul.f32 %v557_v29, %v549_v32 }
 0x1a6   :  { %490 = vrot.lane.b32.xlu0 %v1295_v5, %s1107_s12  ;;  %606 = vmatpush.msrb.mxu0 %v560_v35  ;;  %v484_v35 = vperm.slane %v1476_v47, 3 }
 0x1a7   :  { %626 = vmatpush.msrb.mxu1 %v561_v36  ;;  %v475_v36 = vsel %vm473_vm13, %v1380_v2, %v1421_v24 }
 0x1aa   :  { %v495_v37 = vpop.permute.xlu1 %494  ;;  %v516_v38 = vpop.permute.xlu2 %515 }
 0x1ae   :  { %416 = vrot.lane.b32.xlu0 %v1295_v5, %s1105_s30 }
 0x1b2   :  { %v1457_v4 = vpop.permute.xlu1 %444 }
 0x1ba   :  { %v1461_v40 = vpop.permute.xlu1 %395 }
 0x1d7   :  { %v497_v41 = vpop.permute.xlu2 %496 }
 0x1d8   :  { %v501_v16 = vsel %vm498_vm12, %v495_v37, %v497_v41  ;;  %v506_v22 = vsel %vm498_vm12, %v497_v41, 0.0 }
 0x1df   :  { %v1485_v52 = vpop.permute.xlu2 %446 }
 0x1e7   :  { %v1507_v11 = vpop.permute.xlu2 %397 }
 0x1ef   :  { %v547_v46 = vpop.permute.xlu1 %546  ;;  %v1536_v41 = vpop.permute.xlu2 %440 }
 0x1f0   :  { %v571_v49 = vpop.permute.xlu0 %570  ;;  %v550_v53 = vsel %vm205_vm7, %v545_v30, %v547_v46  ;;  %v555_v54 = vsel %vm205_vm7, %v547_v46, 0.0  ;;  %v459_v46 = vperm.slane %v1476_v47, 2 }
 0x1f1   :  { %v575_v56 = vsel %vm572_vm10, %v569_v21, %v571_v49  ;;  %v580_v57 = vsel %vm572_vm10, %v571_v49, 0.0  ;;  %v562_v60 = vmul.f32 %v558_v50, %v550_v53  ;;  %v563_v61 = vmul.f32 %v559_v51, %v555_v54 }
 0x1f2   :  { %v587_v58 = vmul.f32 %v1466_v43, %v575_v56  ;;  %v588_v59 = vmul.f32 %v1471_v45, %v580_v57  ;;  %v510_v21 = vperm.slane %v1481_v48, 5  ;;  %v485_v49 = vperm.slane %v1481_v48, 3 }
 0x1f3   :  { %v434_v53 = vperm.slane %v1476_v47, 1  ;;  %v450_v54 = vsel %vm448_vm14, %v1385_v7, %v1457_v4  ;;  %v488_v57 = vmul.f32 %v484_v35, %v475_v36 }
 0x1f4   :  { %645 = vmatpush.msrb.mxu2 %v587_v58  ;;  %665 = vmatpush.msrb.mxu3 %v588_v59  ;;  %v386_v58 = vld [vmem:[%s1870_s5] sm:$0xf]  ;;  %v425_v59 = vsel %vm194_vm1, %v1459_v39, %v1429_v25 }
 0x1f6   :  { %646 = vmatpush.msrb.mxu2 %v562_v60  ;;  %666 = vmatpush.msrb.mxu3 %v563_v61  ;;  %v449_v60 = vsel %vm448_vm14, %v1536_v41, %v1385_v7 }
 0x1f7   :  { %v518_v1 = vpop.permute.xlu1 %517 }
 0x1f8   :  { %v524_v3 = vsel %vm523_vm11, %v516_v38, %v518_v1  ;;  %v525_v6 = vsel %vm523_vm11, %v518_v1, %v520_v42  ;;  %v1501_v8 = vpop.permute.xlu0 %393  ;;  %v514_v38 = vmul.f32 %v510_v21, %v506_v22  ;;  %v385_v22 = vld [vmem:[%s1871_s4] sm:$0xf] }
 0x1f9   :  { %v536_v9 = vmul.f32 %v532_v63, %v524_v3  ;;  %v537_v10 = vmul.f32 %v533_v0, %v525_v6  ;;  %v460_v3 = vperm.slane %v1481_v48, 2  ;;  %v451_v6 = vsel %vm448_vm14, %v1457_v4, %v1485_v52 }
 0x1fa   :  { %v438_v52 = vmul.f32 %v434_v53, %v425_v59 }
 0x1fb   :  { %607 = vmatpush.msrb.mxu0 %v536_v9  ;;  %627 = vmatpush.msrb.mxu1 %v537_v10  ;;  %v1109_v10 = vmov 0  }
 0x1fc   :  { %1079 = vset.pattern.permute.xlu2 %v1109_v10  ;;  %1080 = vset.pattern.permute.xlu0 %v1109_v10 }
 0x1fd   :  { %591 = vperm.xlu2 %1079, %v386_v58   ;;  %v456_v58 = vsel %vm448_vm14, 0.0, %v1536_v41 }
 0x1ff   :  { %v1512_v15 = vpop.permute.xlu1 %492 }
 0x200   :  { %v500_v17 = vsel %vm498_vm12, %v1512_v15, %v495_v37  ;;  %v522_v44 = vpop.permute.xlu0 %521  ;;  %v513_v37 = vmul.f32 %v509_v19, %v501_v16  ;;  %v464_v16 = vmul.f32 %v460_v3, %v451_v6  ;;  %v408_v6 = vperm.slane %v1436_v26, 0 }
 0x201   :  { %v526_v23 = vsel %vm523_vm11, %v520_v42, %v522_v44  ;;  %v531_v30 = vsel %vm523_vm11, %v522_v44, 0.0  ;;  %v512_v31 = vmul.f32 %v508_v12, %v500_v17  ;;  %v483_v42 = vperm.slane %v1441_v27, 3 }
 0x202   :  { %v538_v32 = vmul.f32 %v534_v13, %v526_v23  ;;  %v539_v34 = vmul.f32 %v535_v14, %v531_v30  ;;  %v435_v44 = vperm.slane %v1481_v48, 1  ;;  %v411_v30 = vperm.slane %v1481_v48, 0 }
 0x203   :  { %628 = vmatpush.msrb.mxu1 %v512_v31  ;;  %v402_v31 = vsel %vm399_vm15, %v1461_v40, %v1507_v11  ;;  %v482_v11 = vperm.slane %v1436_v26, 3 }
 0x204   :  { %647 = vmatpush.msrb.mxu2 %v538_v32  ;;  %667 = vmatpush.msrb.mxu3 %v539_v34  ;;  %v415_v36 = vmul.f32 %v411_v30, %v402_v31 }
 0x205   :  { %629 = vmatpush.msrb.mxu1 %v1327_v33  ;;  %v458_v33 = vperm.slane %v1441_v27, 2 }
 0x206   :  { %648 = vmatpush.msrb.mxu2 %v513_v37  ;;  %668 = vmatpush.msrb.mxu3 %v514_v38  ;;  %v507_v37 = vperm.slane %v1436_v26, 5 }
 0x207   :  { %v466_v56 = vpop.permute.xlu1 %465  ;;  %v462_v4 = vmul.f32 %v458_v33, %v449_v60 }
 0x208   :  { %v474_v61 = vsel %vm473_vm13, %v466_v56, %v1380_v2  ;;  %649 = vmatpush.msrb.mxu2 %v1351_v55  ;;  %669 = vmatpush.msrb.mxu3 %v1394_v18  ;;  %v472_v1 = vpop.permute.xlu0 %471  ;;  %v463_v55 = vmul.f32 %v459_v46, %v450_v54  ;;  %v410_v18 = vperm.slane %v1476_v47, 0  ;;  %v481_v54 = vsel %vm473_vm13, 0.0, %v466_v56 }
 0x209   :  { %v476_v9 = vsel %vm473_vm13, %v1421_v24, %v472_v1  ;;  %v487_v7 = vmul.f32 %v483_v42, %v474_v61  ;;  %v401_v24 = vsel %vm399_vm15, %v1501_v8, %v1461_v40  ;;  %v486_v60 = vmul.f32 %v482_v11, %v481_v54 }
 0x20a   :  { %650 = vmatpush.msrb.mxu2 %v488_v57  ;;  %v489_v2 = vmul.f32 %v485_v49, %v476_v9  ;;  %v414_v17 = vmul.f32 %v410_v18, %v401_v24  ;;  %v457_v57 = vperm.slane %v1436_v26, 2  ;;  %v433_v61 = vperm.slane %v1441_v27, 1 }
 0x20b   :  { %630 = vmatpush.msrb.mxu1 %v487_v7  ;;  %v409_v9 = vperm.slane %v1441_v27, 0 }
 0x20c   :  { %651 = vmatpush.msrb.mxu2 %v463_v55  ;;  %670 = vmatpush.msrb.mxu3 %v489_v2  ;;  %v461_v56 = vmul.f32 %v457_v57, %v456_v58 }
 0x20d   :  { %631 = vmatpush.msrb.mxu1 %v462_v4 }
 0x20e   :  { %652 = vmatpush.msrb.mxu2 %v438_v52  ;;  %671 = vmatpush.msrb.mxu3 %v464_v16 }
 0x20f   :  { %v392_v59 = vpop.permute.xlu1 %391 }
 0x210   :  { %653 = vmatpush.msrb.mxu2 %v414_v17  ;;  %v423_v23 = vpop.permute.xlu0 %422  ;;  %v400_v41 = vsel %vm399_vm15, %v392_v59, %v1501_v8 }
 0x211   :  { %v426_v32 = vsel %vm194_vm1, %v1429_v25, %v423_v23  ;;  %1043 = vmatmul.msk.f32.vlgmr.msrb.gmra.mxu2 %vm594_vm0, %v385_v22  ;;  %v413_v8 = vmul.f32 %v409_v9, %v400_v41 }
 0x212   :  { %v439_v34 = vmul.f32 %v435_v44, %v426_v32 }
 0x214   :  { %672 = vmatpush.msrb.mxu3 %v439_v34 }
 0x216   :  { %673 = vmatpush.msrb.mxu3 %v415_v36 }
 0x217   :  { %1044 = vmatmul.msk.f32.vlgmr.msrb.gmra.mxu3 %vm594_vm0, %v385_v22 }
 0x218   :  { %v491_v38 = vpop.permute.xlu0 %490 }
 0x219   :  { %v499_v40 = vsel %vm498_vm12, %v491_v38, %v1512_v15  ;;  %v432_v15 = vperm.slane %v1436_v26, 1 }
 0x21a   :  { %v511_v25 = vmul.f32 %v507_v37, %v499_v40 }
 0x21c   :  { %608 = vmatpush.msrb.mxu0 %v511_v25  ;;  %v683_v25 = vld [vmem:[%s1872_s7] sm:$0xf] }
 0x21e   :  { %609 = vmatpush.msrb.mxu0 %v1295_v5  ;;  %v407_v5 = vsel %vm399_vm15, 0.0, %v392_v59 }
 0x21f   :  { %v412_v24 = vmul.f32 %v408_v6, %v407_v5 }
 0x220   :  { %610 = vmatpush.msrb.mxu0 %v486_v60  ;;  %v417_v1 = vpop.permute.xlu0 %416 }
 0x221   :  { %v424_v7 = vsel %vm194_vm1, %v417_v1, %v1459_v39  ;;  %v431_v10 = vsel %vm194_vm1, 0.0, %v417_v1 }
 0x222   :  { %611 = vmatpush.msrb.mxu0 %v461_v56  ;;  %v436_v55 = vmul.f32 %v432_v15, %v431_v10  ;;  %v437_v2 = vmul.f32 %v433_v61, %v424_v7 }
 0x224   :  { %612 = vmatpush.msrb.mxu0 %v436_v55  ;;  %632 = vmatpush.msrb.mxu1 %v437_v2 }
 0x226   :  { %613 = vmatpush.msrb.mxu0 %v412_v24  ;;  %633 = vmatpush.msrb.mxu1 %v413_v8 }
 0x227   :  { %1041 = vmatmul.msk.f32.vlgmr.msrb.gmra.mxu0 %vm594_vm0, %v385_v22  ;;  %1042 = vmatmul.msk.f32.vlgmr.msrb.gmra.mxu1 %vm594_vm0, %v385_v22 }
 0x257   :  { %v592_v39 = vpop.permute.xlu2 %591 }
 0x294   :  { %v655_v36 = vpop.f32.mrf.mxu2 }
 0x295   :  { %v656_v38 = vadd.f32 %v655_v36, %v592_v39 }
 0x297   :  { %v1673_v40 = vmax.f32 %v656_v38, 0.0 }
 0x29a   :  { %v675_v22 = vpop.f32.mrf.mxu3 }
 0x29b   :  { %v676_v32 = vadd.f32 %v675_v22, %v592_v39 }
 0x29d   :  { %v1665_v34 = vmax.f32 %v676_v32, 0.0 }
 0x2a4   :  { %v615_v4 = vpop.f32.mrf.mxu0  ;;  %v635_v17 = vpop.f32.mrf.mxu1 }
 0x2a5   :  { %v616_v52 = vadd.f32 %v615_v4, %v592_v39  ;;  %v636_v23 = vadd.f32 %v635_v17, %v592_v39 }
 0x2a7   :  { %v1637_v16 = vmax.f32 %v616_v52, 0.0  ;;  %v1645_v31 = vmax.f32 %v636_v23, 0.0 }
 0x2a9   :  { %788 = vrot.lane.b32.xlu1 %v1637_v16, %s1106_s11  ;;  %828 = vrot.lane.b32.xlu0 %v1637_v16, %s1101_s1 }
 0x2aa   :  { %808 = vrot.lane.b32.xlu2 %v1637_v16, %s1102_s15 }
 0x2b1   :  { %768 = vrot.lane.b32.xlu0 %v1637_v16, %s1107_s12  ;;  %830 = vrot.lane.b32.xlu1 %v1645_v31, %s1101_s1 }
 0x2b2   :  { %748 = vrot.lane.b32.xlu2 %v1637_v16, %s1103_s16 }
 0x2b9   :  { %710 = vrot.lane.b32.xlu1 %v1645_v31, %s1105_s30  ;;  %810 = vrot.lane.b32.xlu0 %v1645_v31, %s1102_s15 }
 0x2ba   :  { %750 = vrot.lane.b32.xlu2 %v1645_v31, %s1103_s16 }
 0x2c1   :  { %790 = vrot.lane.b32.xlu1 %v1645_v31, %s1106_s11  ;;  %770 = vrot.lane.b32.xlu0 %v1645_v31, %s1107_s12 }
 0x2c2   :  { %730 = vrot.lane.b32.xlu2 %v1645_v31, %s1104_s21 }
 0x2c9   :  { %690 = vrot.lane.b32.xlu1 %v1645_v31, %s1108_s13  ;;  %814 = vrot.lane.b32.xlu0 %v1665_v34, %s1102_s15 }
 0x2ca   :  { %774 = vrot.lane.b32.xlu2 %v1665_v34, %s1107_s12 }
 0x2d1   :  { %834 = vrot.lane.b32.xlu1 %v1665_v34, %s1101_s1  ;;  %794 = vrot.lane.b32.xlu0 %v1665_v34, %s1106_s11 }
 0x2d2   :  { %832 = vrot.lane.b32.xlu2 %v1673_v40, %s1101_s1 }
 0x2d9   :  { %812 = vrot.lane.b32.xlu1 %v1673_v40, %s1102_s15  ;;  %752 = vrot.lane.b32.xlu0 %v1673_v40, %s1103_s16 }
 0x2da   :  { %772 = vrot.lane.b32.xlu2 %v1673_v40, %s1107_s12 }
 0x2e1   :  { %754 = vrot.lane.b32.xlu1 %v1665_v34, %s1103_s16  ;;  %792 = vrot.lane.b32.xlu0 %v1673_v40, %s1106_s11 }
 0x2e2   :  { %714 = vrot.lane.b32.xlu2 %v1665_v34, %s1105_s30 }
 0x2e9   :  { %712 = vrot.lane.b32.xlu1 %v1673_v40, %s1105_s30  ;;  %732 = vrot.lane.b32.xlu0 %v1673_v40, %s1104_s21 }
 0x2ea   :  { %692 = vrot.lane.b32.xlu2 %v1673_v40, %s1108_s13 }
 0x2f1   :  { %734 = vrot.lane.b32.xlu1 %v1665_v34, %s1104_s21  ;;  %694 = vrot.lane.b32.xlu0 %v1665_v34, %s1108_s13 }
 0x2f2   :  { %708 = vrot.lane.b32.xlu2 %v1637_v16, %s1105_s30 }
 0x2f9   :  { %688 = vrot.lane.b32.xlu1 %v1637_v16, %s1108_s13  ;;  %728 = vrot.lane.b32.xlu0 %v1637_v16, %s1104_s21 }
 0x2fa   :  { %914 = vperm.xlu2 %1079, %v683_v25  }
 0x304   :  { %v809_v54 = vpop.permute.xlu2 %808 }
 0x30c   :  { %v1712_v58 = vpop.permute.xlu2 %748 }
 0x314   :  { %v1714_v59 = vpop.permute.xlu2 %750 }
 0x315   :  { %v1719_v60 = vsel %vm473_vm13, %v1712_v58, %v1714_v59 }
 0x31b   :  { %v789_v1 = vpop.permute.xlu1 %788  ;;  %v829_v56 = vpop.permute.xlu0 %828 }
 0x31c   :  { %v1721_v41 = vpop.permute.xlu2 %730 }
 0x323   :  { %v769_v5 = vpop.permute.xlu0 %768  ;;  %v831_v7 = vpop.permute.xlu1 %830 }
 0x324   :  { %v836_v10 = vsel %vm572_vm10, %v829_v56, %v831_v7  ;;  %v775_v55 = vpop.permute.xlu2 %774 }
 0x325   :  { %v844_v2 = vmul.f32 %v1376_v62, %v836_v10  ;;  %v783_v10 = vsel %vm498_vm12, %v775_v55, 0.0 }
 0x327   :  { %1045 = vmatpush.msk.msra.mxu0 %vm220_vm8, %v844_v2 }
 0x32b   :  { %v1726_v24 = vpop.permute.xlu1 %710  ;;  %v811_v8 = vpop.permute.xlu0 %810 }
 0x32c   :  { %v833_v39 = vpop.permute.xlu2 %832  ;;  %v816_v52 = vsel %vm205_vm7, %v809_v54, %v811_v8 }
 0x32d   :  { %v837_v4 = vsel %vm572_vm10, %v831_v7, %v833_v39  ;;  %v824_v23 = vmul.f32 %v816_v52, %v556_v28 }
 0x32e   :  { %v845_v17 = vmul.f32 %v1411_v20, %v837_v4 }
 0x32f   :  { %v888_v38 = vrot.slane %v824_v23, 4 }
 0x330   :  { %1047 = vmatpush.msk.msra.mxu1 %vm220_vm8, %v845_v17 }
 0x333   :  { %v791_v22 = vpop.permute.xlu1 %790  ;;  %v771_v32 = vpop.permute.xlu0 %770 }
 0x334   :  { %v796_v62 = vsel %vm523_vm11, %v789_v1, %v791_v22  ;;  %v776_v36 = vsel %vm498_vm12, %v769_v5, %v771_v32  ;;  %v773_v23 = vpop.permute.xlu2 %772 }
 0x335   :  { %v804_v25 = vmul.f32 %v796_v62, %v532_v63  ;;  %v784_v54 = vmul.f32 %v776_v36, %v507_v37  ;;  %v787_v37 = vmul.f32 %v783_v10, %v510_v21 }
 0x337   :  { %v876_v56 = vrot.slane %v784_v54, 4  ;;  %v908_v20 = vsel %vm220_vm8, %v804_v25, %v888_v38  ;;  %v879_v25 = vrot.slane %v787_v37, 4 }
 0x338   :  { %945 = vmatpush.msra.mxu0 %v908_v20 }
 0x339   :  { %v904_v28 = vsel %vm220_vm8, %v1637_v16, %v876_v56 }
 0x33a   :  { %946 = vmatpush.msra.mxu0 %v904_v28 }
 0x33b   :  { %v1743_v7 = vpop.permute.xlu1 %690  ;;  %v815_v1 = vpop.permute.xlu0 %814 }
 0x33c   :  { %v823_v5 = vsel %vm205_vm7, %v815_v1, 0.0  ;;  %v715_v28 = vpop.permute.xlu2 %714 }
 0x33d   :  { %v827_v63 = vmul.f32 %v823_v5, %v559_v51 }
 0x33f   :  { %v891_v62 = vrot.slane %v827_v63, 4 }
 0x343   :  { %v835_v2 = vpop.permute.xlu1 %834  ;;  %v795_v4 = vpop.permute.xlu0 %794 }
 0x344   :  { %v838_v52 = vsel %vm572_vm10, %v833_v39, %v835_v2  ;;  %v843_v16 = vsel %vm572_vm10, %v835_v2, 0.0  ;;  %v803_v17 = vsel %vm523_vm11, %v795_v4, 0.0  ;;  %v907_v39 = vsel %vm220_vm8, %v1665_v34, %v879_v25 }
 0x345   :  { %v846_v36 = vmul.f32 %v1466_v43, %v838_v52  ;;  %v847_v38 = vmul.f32 %v1471_v45, %v843_v16  ;;  %v807_v51 = vmul.f32 %v803_v17, %v535_v14  ;;  %v777_v43 = vsel %vm498_vm12, %v771_v32, %v773_v23 }
 0x346   :  { %v778_v45 = vsel %vm498_vm12, %v773_v23, %v775_v55  ;;  %v785_v5 = vmul.f32 %v777_v43, %v508_v12  ;;  %v682_v43 = vld [vmem:[%s1873_s6] sm:$0xf] }
 0x347   :  { %1049 = vmatpush.msk.msra.mxu2 %vm220_vm8, %v846_v36  ;;  %1051 = vmatpush.msk.msra.mxu3 %vm220_vm8, %v847_v38  ;;  %v911_v21 = vsel %vm220_vm8, %v807_v51, %v891_v62  ;;  %v786_v10 = vmul.f32 %v778_v45, %v509_v19  ;;  %v763_v45 = vsel %vm473_vm13, 0.0, %v1712_v58 }
 0x348   :  { %v877_v55 = vrot.slane %v785_v5, 4 }
 0x349   :  { %1005 = vmatpush.msra.mxu3 %v911_v21  ;;  %v878_v2 = vrot.slane %v786_v10, 4 }
 0x34a   :  { %v905_v23 = vsel %vm220_vm8, %v1645_v31, %v877_v55 }
 0x34b   :  { %v813_v54 = vpop.permute.xlu1 %812  ;;  %v753_v56 = vpop.permute.xlu0 %752  ;;  %1006 = vmatpush.msra.mxu3 %v907_v39 }
 0x34c   :  { %v817_v14 = vsel %vm205_vm7, %v811_v8, %v813_v54  ;;  %v818_v20 = vsel %vm205_vm7, %v813_v54, %v815_v1 }
 0x34d   :  { %v825_v34 = vmul.f32 %v817_v14, %v557_v29  ;;  %v826_v63 = vmul.f32 %v818_v20, %v558_v50  ;;  %v757_v29 = vsel %vm473_vm13, %v1714_v59, %v753_v56 }
 0x34f   :  { %v889_v52 = vrot.slane %v825_v34, 4  ;;  %v890_v16 = vrot.slane %v826_v63, 4  ;;  %v765_v34 = vmul.f32 %v1719_v60, %v483_v42 }
 0x353   :  { %v755_v32 = vpop.permute.xlu1 %754  ;;  %v793_v37 = vpop.permute.xlu0 %792 }
 0x354   :  { %v797_v8 = vsel %vm523_vm11, %v791_v22, %v793_v37  ;;  %v798_v1 = vsel %vm523_vm11, %v793_v37, %v795_v4  ;;  %v693_v22 = vpop.permute.xlu2 %692  ;;  %v766_v4 = vmul.f32 %v757_v29, %v484_v35  ;;  %v758_v51 = vsel %vm473_vm13, %v753_v56, %v755_v32 }
 0x355   :  { %v805_v12 = vmul.f32 %v797_v8, %v533_v0  ;;  %v806_v19 = vmul.f32 %v798_v1, %v534_v13  ;;  %v906_v0 = vsel %vm220_vm8, %v1673_v40, %v878_v2  ;;  %v697_v62 = vsel %vm399_vm15, %v1743_v7, %v693_v22 }
 0x356   :  { %v866_v35 = vrot.slane %v766_v4, 4  ;;  %v706_v25 = vmul.f32 %v697_v62, %v410_v18 }
 0x357   :  { %v909_v50 = vsel %vm220_vm8, %v805_v12, %v889_v52  ;;  %v910_v17 = vsel %vm220_vm8, %v806_v19, %v890_v16 }
 0x358   :  { %965 = vmatpush.msra.mxu1 %v909_v50  ;;  %985 = vmatpush.msra.mxu2 %v910_v17 }
 0x35a   :  { %966 = vmatpush.msra.mxu1 %v905_v23  ;;  %986 = vmatpush.msra.mxu2 %v906_v0 }
 0x35b   :  { %v713_v13 = vpop.permute.xlu1 %712  ;;  %v733_v59 = vpop.permute.xlu0 %732 }
 0x35c   :  { %v717_v36 = vsel %vm194_vm1, %v1726_v24, %v713_v13  ;;  %v737_v38 = vsel %vm448_vm14, %v1721_v41, %v733_v59  ;;  %v718_v54 = vsel %vm194_vm1, %v713_v13, %v715_v28  ;;  %v709_v28 = vpop.permute.xlu2 %708 }
 0x35d   :  { %v726_v31 = vmul.f32 %v717_v36, %v434_v53  ;;  %v746_v40 = vmul.f32 %v737_v38, %v459_v46  ;;  %v767_v53 = vmul.f32 %v758_v51, %v485_v49  ;;  %v727_v47 = vmul.f32 %v718_v54, %v435_v44 }
 0x35e   :  { %v764_v44 = vmul.f32 %v763_v45, %v482_v11  ;;  %v716_v32 = vsel %vm194_vm1, %v709_v28, %v1726_v24  ;;  %v723_v37 = vsel %vm194_vm1, 0.0, %v709_v28 }
 0x35f   :  { %v854_v21 = vrot.slane %v726_v31, 4  ;;  %v902_v39 = vsel %vm220_vm8, %v746_v40, %v866_v35  ;;  %v867_v5 = vrot.slane %v767_v53, 4  ;;  %v855_v58 = vrot.slane %v727_v47, 4 }
 0x360   :  { %987 = vmatpush.msra.mxu2 %v902_v39  ;;  %v864_v48 = vrot.slane %v764_v44, 4  ;;  %v724_v11 = vmul.f32 %v723_v37, %v432_v15  ;;  %v725_v42 = vmul.f32 %v716_v32, %v433_v61 }
 0x361   :  { %v898_v46 = vsel %vm220_vm8, %v706_v25, %v854_v21 }
 0x362   :  { %988 = vmatpush.msra.mxu2 %v898_v46  ;;  %v853_v12 = vrot.slane %v725_v42, 4 }
 0x363   :  { %v735_v18 = vpop.permute.xlu1 %734  ;;  %v695_v56 = vpop.permute.xlu0 %694  ;;  %1050 = vmatmul.msk.f32.vlgmr.msra.gmra.mxu2 %vm917_vm2, %v682_v43 }
 0x364   :  { %v738_v14 = vsel %vm448_vm14, %v733_v59, %v735_v18  ;;  %v698_v20 = vsel %vm399_vm15, %v693_v22, %v695_v56  ;;  %v915_v27 = vpop.permute.xlu2 %914 }
 0x365   :  { %v747_v49 = vmul.f32 %v738_v14, %v460_v3  ;;  %v707_v10 = vmul.f32 %v698_v20, %v411_v30  ;;  %v865_v30 = vrot.slane %v765_v34, 4 }
 0x367   :  { %v903_v63 = vsel %vm220_vm8, %v747_v49, %v867_v5  ;;  %v899_v3 = vsel %vm220_vm8, %v707_v10, %v855_v58 }
 0x368   :  { %1007 = vmatpush.msra.mxu3 %v903_v63 }
 0x36a   :  { %1008 = vmatpush.msra.mxu3 %v899_v3 }
 0x36b   :  { %v689_v60 = vpop.permute.xlu1 %688  ;;  %v729_v55 = vpop.permute.xlu0 %728  ;;  %1052 = vmatmul.msk.f32.vlgmr.msra.gmra.mxu3 %vm917_vm2, %v682_v43 }
 0x36c   :  { %v696_v24 = vsel %vm399_vm15, %v689_v60, %v1743_v7  ;;  %v703_v2 = vsel %vm399_vm15, 0.0, %v689_v60  ;;  %v736_v8 = vsel %vm448_vm14, %v729_v55, %v1721_v41  ;;  %v743_v1 = vsel %vm448_vm14, 0.0, %v729_v55 }
 0x36d   :  { %v704_v15 = vmul.f32 %v703_v2, %v408_v6  ;;  %v705_v61 = vmul.f32 %v696_v24, %v409_v9  ;;  %v744_v52 = vmul.f32 %v743_v1, %v457_v57  ;;  %v745_v16 = vmul.f32 %v736_v8, %v458_v33 }
 0x36e   :  { %v852_v7 = vrot.slane %v724_v11, 4 }
 0x36f   :  { %v900_v19 = vsel %vm220_vm8, %v744_v52, %v864_v48  ;;  %v901_v41 = vsel %vm220_vm8, %v745_v16, %v865_v30  ;;  %v897_v6 = vsel %vm220_vm8, %v705_v61, %v853_v12 }
 0x370   :  { %947 = vmatpush.msra.mxu0 %v900_v19  ;;  %967 = vmatpush.msra.mxu1 %v901_v41  ;;  %v896_v29 = vsel %vm220_vm8, %v704_v15, %v852_v7 }
 0x372   :  { %948 = vmatpush.msra.mxu0 %v896_v29  ;;  %968 = vmatpush.msra.mxu1 %v897_v6 }
 0x373   :  { %1046 = vmatmul.msk.f32.vlgmr.msra.gmra.mxu0 %vm917_vm2, %v682_v43  ;;  %1048 = vmatmul.msk.f32.vlgmr.msra.gmra.mxu1 %vm917_vm2, %v682_v43 }
 0x3e6   :  { %v990_v26 = vpop.f32.mrf.mxu2 }
 0x3e7   :  { %v991_v57 = vadd.f32 %v990_v26, %v915_v27 }
 0x3e9   :  { %v1015_v0 = vmax.f32 %v991_v57, 0.0 }
 0x3ee   :  { %v1010_v33 = vpop.f32.mrf.mxu3 }
 0x3ef   :  { %v1011_v9 = vadd.f32 %v1010_v33, %v915_v27 }
 0x3f0   :  { %v950_v50 = vpop.f32.mrf.mxu0  ;;  %v970_v17 = vpop.f32.mrf.mxu1 }
 0x3f1   :  { %v1016_v22 = vmax.f32 %v1011_v9, 0.0  ;;  %v951_v4 = vadd.f32 %v950_v50, %v915_v27  ;;  %v971_v23 = vadd.f32 %v970_v17, %v915_v27 }
 0x3f3   :  { %v1025_v13 = vrot.slane %v1016_v22, 4  ;;  %v1014_v59 = vmax.f32 %v971_v23, 0.0  ;;  %v1013_v36 = vmax.f32 %v951_v4, 0.0 }
 0x3f5   :  { %v1026_v62 = vsel %vm220_vm8, %v1015_v0, %v1025_v13  ;;  %v1019_v38 = vrot.slane %v1014_v59, 4 }
 0x3f6   :  { %1053 = vst [vmem:[%s1874_s8 + $0x8] sm:$0xff] %v1026_v62 }
 0x3f7   :  { %v1020_v35 = vsel %vm220_vm8, %v1013_v36, %v1019_v38 }
 0x3f8   :  { %1022 = vst [vmem:[%s1874_s8] sm:$0xff] %v1020_v35 }

</bundles_post_ra>
